<compile_context>
chip_gen: v7x
topology: tpu7x:2x2x1
jax: 0.10.0
libtpu: 0.0.40
codegen_flags: <defaults>
</compile_context>

<pallas_src>
import functools

import jax
import jax.numpy as jnp
import numpy as np
from jax.experimental import pallas as pl
from jax.experimental.pallas import tpu as pltpu


# ------------------------------ fused kernel -----------------------------------

def fused_kernel(*refs, bs, nf, nh, k, nt, ec, ct, spatial, ch, w_off):
    # refs layout (whole batch, single invocation):
    #   refs[0:nf]   x_l      (bs*H_l*W_l, C_l)   channel-last pixels on sublanes
    #   then: text   (bs*nt, ct)
    #         wconv  (sum_l pad8(C_l), ec)        row-packed, (C_l, ec) blocks
    #         bconv  (nf, ec)
    #         wqkv   (ct + 2*ec, ec)              rows: wq | wk | wv (scale folded)
    #         bqkv   (3, ec)                      rows: bq | bk | bv
    #         wp     (ec, ct), bp (1, ct)
    #         hmask  (bs*nh*nt, ec)  0/1 f32      head block-diagonal mask
    #         abias  (bs*nh*nt, bs*np) f32        0 same-batch / -1e9 cross-batch
    #         out    (bs*nt, ct)
    x_refs = refs[:nf]
    (text_ref, wconv_ref, bconv_ref, wqkv_ref, bqkv_ref,
     wp_ref, bp_ref, hmask_ref, abias_ref, out_ref) = refs[nf:]

    # ---- 1x1 conv (channels contracted) + adaptive max pool, bias after pool ---
    pooled = []                                   # per level: (bs*k*k, ec)
    for l, (H, W) in enumerate(spatial):
        C = ch[l]
        ph, pw = H // k, W // k
        x = x_refs[l][...]                                        # (bs*H*W, C)
        w = wconv_ref[pl.ds(w_off[l], C), :]                      # (C, ec)
        y = jnp.dot(x, w, preferred_element_type=jnp.float32)     # (bs*H*W, ec)
        # rows ordered (b, i, r, j, c) with window (i, j); pool over c then r.
        y = jnp.max(y.reshape(bs * H * k, pw, ec), axis=1)        # (b, i, r, j)
        y = jnp.max(y.reshape(bs * k, ph, k, ec), axis=1)         # (b, i, j)
        y = y.reshape(bs * k * k, ec) + bconv_ref[pl.ds(l, 1), :]  # exact: bias
        pooled.append(y)                                          #  after pool

    # per-batch concat over levels: row = b*np + l*k*k + (i*k + j)
    xin = jnp.concatenate(
        [pooled[l][b * k * k:(b + 1) * k * k]
         for b in range(bs) for l in range(nf)], axis=0)          # (bs*np, ec)

    def _norm(z, eps=1e-5):
        # LayerNorm without affine: gamma/beta folded into the following Linear.
        mu = jnp.mean(z, axis=-1, keepdims=True)
        zc = z - mu
        var = jnp.mean(zc * zc, axis=-1, keepdims=True)
        return zc * jax.lax.rsqrt(var + eps)

    t = text_ref[...]                                             # (bs*nt, ct)
    tn = _norm(t)
    xn = _norm(xin)

    wq = wqkv_ref[pl.ds(0, ct), :]           # (ct, ec), 1/sqrt(hc) pre-folded
    wk = wqkv_ref[pl.ds(ct, ec), :]          # (ec, ec)
    wv = wqkv_ref[pl.ds(ct + ec, ec), :]     # (ec, ec)
    q = jnp.dot(tn, wq, preferred_element_type=jnp.float32) + bqkv_ref[pl.ds(0, 1), :]
    km = jnp.dot(xn, wk, preferred_element_type=jnp.float32) + bqkv_ref[pl.ds(1, 1), :]
    vm = jnp.dot(xn, wv, preferred_element_type=jnp.float32) + bqkv_ref[pl.ds(2, 1), :]

    # ---- all batches & heads in one score matmul: block-diagonal queries -------
    # qblk row r = b*nh*nt + h*nt + n holds q[b*nt+n] restricted to head h's
    # feature slice (precomputed 0/1 mask); cross-batch key columns are killed
    # by the precomputed additive bias before the softmax.
    hmask = hmask_ref[...]                                        # (rows, ec)
    q_rep = jnp.concatenate(
        [q[b * nt:(b + 1) * nt] for b in range(bs) for _ in range(nh)], axis=0)
    qblk = q_rep * hmask                                          # (rows, ec)

    s = jax.lax.dot_general(qblk, km, (((1,), (1,)), ((), ())),
                            preferred_element_type=jnp.float32)   # (rows, bs*np)
    s = s + abias_ref[...]
    s = s - jnp.max(s, axis=-1, keepdims=True)
    p = jnp.exp(s)
    p = p * pl.reciprocal(jnp.sum(p, axis=-1, keepdims=True), approx=True)

    o_full = jnp.dot(p, vm, preferred_element_type=jnp.float32)   # (rows, ec)
    o = jnp.sum((o_full * hmask).reshape(bs, nh, nt, ec),
                axis=1).reshape(bs * nt, ec)                      # (bs*nt, ec)

    proj = jnp.dot(o, wp_ref[...], preferred_element_type=jnp.float32) + bp_ref[...]
    out_ref[...] = (proj + t).astype(out_ref.dtype)   # scale=False -> *1.0 + text


# ------------------------------ wrapper -----------------------------------------

def image_pooling_attn_forward(xs_nchw, text, conv_params, attn_params, nh, k):
    """xs_nchw: list of (bs, C_l, H_l, W_l); text: (bs, nt, ct).

    conv_params: list of (w (ec, C_l), b (ec,))      -- PyTorch Conv2d 1x1 layout.
    attn_params: [gq, bqln, wq, bq, gk, bkln, wk, bk, gv, bvln, wv, bv, wp, bp]
                 with Linear weights stored as (in, out) (pre-transposed).
    """
    bs, nt, ct = text.shape
    nf = len(xs_nchw)
    spatial = tuple((int(x.shape[2]), int(x.shape[3])) for x in xs_nchw)
    ch = tuple(int(x.shape[1]) for x in xs_nchw)
    for (H, W) in spatial:
        # TODO(synk): implement true AdaptiveMaxPool2d window bounds for H, W
        # not divisible by k (overlapping/uneven windows).
        assert H % k == 0 and W % k == 0, "adaptive pool assumes H, W divisible by k"

    (gq, bqln, wq, bq, gk, bkln, wk, bk, gv, bvln, wv, bv, wp, bp) = attn_params
    ec = wq.shape[1]
    hc = ec // nh
    np_tot = nf * k * k
    assert ct % 8 == 0 and ec % 8 == 0, "row-packed weight slabs need 8-aligned splits"

    # Fold LayerNorm affine into the following Linear:
    #   (xhat*g + beta) @ W + b == xhat @ (g[:,None]*W) + (beta @ W + b)
    # and fold the 1/sqrt(hc) attention scale into the query projection.
    scale_q = hc ** -0.5
    wq_f = (wq * gq.reshape(-1, 1)) * scale_q
    bq_f = (bqln.reshape(1, -1) @ wq + bq.reshape(1, -1)) * scale_q
    wk_f = wk * gk.reshape(-1, 1)
    bk_f = bkln.reshape(1, -1) @ wk + bk.reshape(1, -1)
    wv_f = wv * gv.reshape(-1, 1)
    bv_f = bvln.reshape(1, -1) @ wv + bv.reshape(1, -1)

    w_qkv = jnp.concatenate([wq_f, wk_f, wv_f], axis=0)       # (ct+2ec, ec)
    b_qkv = jnp.concatenate([bq_f, bk_f, bv_f], axis=0)       # (3, ec)
    bp_f = bp.reshape(1, -1)                                   # (1, ct)

    # Conv weights pre-transposed to (C, ec) and row-packed (8-row aligned offsets).
    w_blocks, w_off, off = [], [], 0
    for (w, _), C in zip(conv_params, ch):
        wt = w.T                                               # (C, ec)
        pad = (-C) % 8
        if pad:
            wt = jnp.concatenate([wt, jnp.zeros((pad, ec), wt.dtype)], axis=0)
        w_blocks.append(wt)
        w_off.append(off)
        off += C + pad
    w_conv = jnp.concatenate(w_blocks, axis=0)                 # (sum pad8(C_l), ec)
    b_conv = jnp.stack([b for (_, b) in conv_params], axis=0)  # (nf, ec)

    # Features as (bs*H*W, C): channel-last, pixels on sublanes. The small
    # NCHW->NHWC transpose runs in XLA, off the kernel's critical path.
    xs_flat = [x.transpose(0, 2, 3, 1).reshape(bs * H * W, C)
               for x, (H, W), C in zip(xs_nchw, spatial, ch)]

    # Precomputed attention constants (tiny).
    rows = bs * nh * nt
    head_row = (jnp.arange(rows) // nt) % nh
    head_col = jnp.arange(ec) // hc
    hmask = (head_row[:, None] == head_col[None, :]).astype(jnp.float32)
    b_row = jnp.arange(rows) // (nh * nt)
    b_col = jnp.arange(bs * np_tot) // np_tot
    abias = jnp.where(b_row[:, None] == b_col[None, :], 0.0, -1e9).astype(jnp.float32)

    operands = [*xs_flat, text.reshape(bs * nt, ct), w_conv, b_conv,
                w_qkv, b_qkv, wp, bp_f, hmask, abias]

    kernel = functools.partial(fused_kernel, bs=bs, nf=nf, nh=nh, k=k, nt=nt,
                               ec=ec, ct=ct, spatial=spatial, ch=ch,
                               w_off=tuple(w_off))
    out = pl.pallas_call(
        kernel,
        out_shape=jax.ShapeDtypeStruct((bs * nt, ct), jnp.float32),
        # No grid: whole batch in one invocation, every operand a full-array
        # VMEM block (single launch; no serial per-batch grid steps on 1-TC chips).
    )(*operands)
    return out.reshape(bs, nt, ct)


# ------------------------------ pure-JAX reference ------------------------------

def reference_forward(xs_nchw, text, conv_params, attn_params, nh, k):
    (gq, bqln, wq, bq, gk, bkln, wk, bk, gv, bvln, wv, bv, wp, bp) = attn_params
    bs = text.shape[0]
    feats = []
    for x, (w, b) in zip(xs_nchw, conv_params):
        y = jnp.einsum('bchw,ec->behw', x, w) + b[None, :, None, None]
        _, ec, H, W = y.shape
        y = y.reshape(bs, ec, k, H // k, k, W // k).max(axis=(3, 5))
        feats.append(y.reshape(bs, ec, k * k))
    xcat = jnp.concatenate(feats, axis=-1).transpose(0, 2, 1)   # (bs, np, ec)

    def ln(z, g, b_):
        mu = z.mean(-1, keepdims=True)
        var = ((z - mu) ** 2).mean(-1, keepdims=True)
        return (z - mu) / jnp.sqrt(var + 1e-5) * g + b_

    q = ln(text, gq, bqln) @ wq + bq
    kk = ln(xcat, gk, bkln) @ wk + bk
    v = ln(xcat, gv, bvln) @ wv + bv
    nt, npatch, ec = text.shape[1], xcat.shape[1], wq.shape[1]
    hc = ec // nh
    q = q.reshape(bs, nt, nh, hc)
    kk = kk.reshape(bs, npatch, nh, hc)
    v = v.reshape(bs, npatch, nh, hc)
    aw = jnp.einsum('bnmc,bkmc->bmnk', q, kk) / (hc ** 0.5)
    aw = jax.nn.softmax(aw, axis=-1)
    o = jnp.einsum('bmnk,bkmc->bnmc', aw, v).reshape(bs, nt, ec)
    return o @ wp + bp + text


# ------------------------------ main ---------------------------------------------

if __name__ == "__main__":
    # Small, module-consistent shapes.
    bs, ec, ct, nh, k = 2, 32, 64, 4, 3
    ch = (8, 16)                   # nf = 2 feature levels
    spatial = ((12, 12), (6, 6))   # divisible by k
    nt = 8                         # number of text tokens

    key = jax.random.PRNGKey(0)
    keys = iter(jax.random.split(key, 64))

    def rnd(shape, s=0.05):
        return s * jax.random.normal(next(keys), shape, dtype=jnp.float32)

    xs = [jax.random.normal(next(keys), (bs, c, h, w), dtype=jnp.float32)
          for c, (h, w) in zip(ch, spatial)]
    text = jax.random.normal(next(keys), (bs, nt, ct), dtype=jnp.float32)

    # Conv2d 1x1 projections: weight (ec, C_in), bias (ec,) -- PyTorch layout.
    conv_params = [(rnd((ec, c), 0.1), rnd((ec,), 0.02)) for c in ch]

    # Attention params (Linear weights stored as (in, out), i.e. pre-transposed).
    attn_params = [
        1.0 + rnd((ct,), 0.1), rnd((ct,), 0.1),     # query LayerNorm gamma/beta
        rnd((ct, ec), 0.05), rnd((ec,), 0.02),      # query Linear W/b
        1.0 + rnd((ec,), 0.1), rnd((ec,), 0.1),     # key LayerNorm
        rnd((ec, ec), 0.05), rnd((ec,), 0.02),      # key Linear
        1.0 + rnd((ec,), 0.1), rnd((ec,), 0.1),     # value LayerNorm
        rnd((ec, ec), 0.05), rnd((ec,), 0.02),      # value Linear
        rnd((ec, ct), 0.05), rnd((ct,), 0.02),      # proj Linear
    ]

    out = image_pooling_attn_forward(xs, text, conv_params, attn_params, nh, k)
    out = jax.block_until_ready(out)

    ref = reference_forward(xs, text, conv_params, attn_params, nh, k)
    np.testing.assert_allclose(np.asarray(out), np.asarray(ref), rtol=2e-3, atol=2e-3)

    print("KERNEL_OK")
</pallas_src>

<mosaic_0001>
module attributes {stable_mosaic.version = 11 : i64} {
  func.func @fused_kernel(%arg0: memref<288x8xf32, #tpu.memory_space<vmem>>, %arg1: memref<72x16xf32, #tpu.memory_space<vmem>>, %arg2: memref<16x64xf32, #tpu.memory_space<vmem>>, %arg3: memref<24x32xf32, #tpu.memory_space<vmem>>, %arg4: memref<2x32xf32, #tpu.memory_space<vmem>>, %arg5: memref<128x32xf32, #tpu.memory_space<vmem>>, %arg6: memref<3x32xf32, #tpu.memory_space<vmem>>, %arg7: memref<32x64xf32, #tpu.memory_space<vmem>>, %arg8: memref<1x64xf32, #tpu.memory_space<vmem>>, %arg9: memref<64x32xf32, #tpu.memory_space<vmem>>, %arg10: memref<64x36xf32, #tpu.memory_space<vmem>>, %arg11: memref<16x64xf32, #tpu.memory_space<vmem>>) attributes {dimension_semantics = [], scalar_prefetch = 0 : i64, scratch_operands = 0 : i64, tpu.core_type = #tpu.core_type<tc>} {
    %c0 = arith.constant 0 : index
    %c0_0 = arith.constant 0 : index
    %0 = vector.load %arg0[%c0, %c0_0] : memref<288x8xf32, #tpu.memory_space<vmem>>, vector<288x8xf32>
    %c0_1 = arith.constant 0 : index
    %c0_2 = arith.constant 0 : index
    %1 = vector.load %arg3[%c0_1, %c0_2] : memref<24x32xf32, #tpu.memory_space<vmem>>, vector<8x32xf32>
    %cst = arith.constant dense<0.000000e+00> : vector<288x32xf32>
    %2 = tpu.matmul %0, %1, %cst {dimension_numbers = #tpu.dot_dimension_numbers<[1], [0], [0], [1], [0, 0, 1, 1], [], []>} : vector<288x8xf32>, vector<8x32xf32>, vector<288x32xf32> -> vector<288x32xf32>
    %3 = vector.shape_cast %2 : vector<288x32xf32> to vector<72x4x32xf32>
    %cst_3 = arith.constant dense<0xFF800000> : vector<72x32xf32>
    %4 = vector.multi_reduction <maximumf>, %3, %cst_3 [1] : vector<72x4x32xf32> to vector<72x32xf32>
    %5 = vector.shape_cast %4 : vector<72x32xf32> to vector<6x4x3x32xf32>
    %cst_4 = arith.constant dense<0xFF800000> : vector<6x3x32xf32>
    %6 = vector.multi_reduction <maximumf>, %5, %cst_4 [1] : vector<6x4x3x32xf32> to vector<6x3x32xf32>
    %7 = vector.shape_cast %6 : vector<6x3x32xf32> to vector<18x32xf32>
    %c0_5 = arith.constant 0 : index
    %c0_6 = arith.constant 0 : index
    %8 = vector.load %arg4[%c0_5, %c0_6] : memref<2x32xf32, #tpu.memory_space<vmem>>, vector<1x32xf32>
    %9 = vector.broadcast %8 : vector<1x32xf32> to vector<18x32xf32>
    %10 = arith.addf %7, %9 : vector<18x32xf32>
    %c0_7 = arith.constant 0 : index
    %c0_8 = arith.constant 0 : index
    %11 = vector.load %arg1[%c0_7, %c0_8] : memref<72x16xf32, #tpu.memory_space<vmem>>, vector<72x16xf32>
    %c8 = arith.constant 8 : index
    %c0_9 = arith.constant 0 : index
    %12 = vector.load %arg3[%c8, %c0_9] : memref<24x32xf32, #tpu.memory_space<vmem>>, vector<16x32xf32>
    %cst_10 = arith.constant dense<0.000000e+00> : vector<72x32xf32>
    %13 = tpu.matmul %11, %12, %cst_10 {dimension_numbers = #tpu.dot_dimension_numbers<[1], [0], [0], [1], [0, 0, 1, 1], [], []>} : vector<72x16xf32>, vector<16x32xf32>, vector<72x32xf32> -> vector<72x32xf32>
    %14 = vector.shape_cast %13 : vector<72x32xf32> to vector<36x2x32xf32>
    %cst_11 = arith.constant dense<0xFF800000> : vector<36x32xf32>
    %15 = vector.multi_reduction <maximumf>, %14, %cst_11 [1] : vector<36x2x32xf32> to vector<36x32xf32>
    %16 = vector.shape_cast %15 : vector<36x32xf32> to vector<6x2x3x32xf32>
    %cst_12 = arith.constant dense<0xFF800000> : vector<6x3x32xf32>
    %17 = vector.multi_reduction <maximumf>, %16, %cst_12 [1] : vector<6x2x3x32xf32> to vector<6x3x32xf32>
    %18 = vector.shape_cast %17 : vector<6x3x32xf32> to vector<18x32xf32>
    %c1 = arith.constant 1 : index
    %c0_13 = arith.constant 0 : index
    %19 = vector.load %arg4[%c1, %c0_13] : memref<2x32xf32, #tpu.memory_space<vmem>>, vector<1x32xf32>
    %20 = vector.broadcast %19 : vector<1x32xf32> to vector<18x32xf32>
    %21 = arith.addf %18, %20 : vector<18x32xf32>
    %22 = vector.extract_strided_slice %10 {offsets = [0, 0], sizes = [9, 32], strides = [1, 1]} : vector<18x32xf32> to vector<9x32xf32>
    %23 = vector.extract_strided_slice %21 {offsets = [0, 0], sizes = [9, 32], strides = [1, 1]} : vector<18x32xf32> to vector<9x32xf32>
    %24 = vector.extract_strided_slice %10 {offsets = [9, 0], sizes = [9, 32], strides = [1, 1]} : vector<18x32xf32> to vector<9x32xf32>
    %25 = vector.extract_strided_slice %21 {offsets = [9, 0], sizes = [9, 32], strides = [1, 1]} : vector<18x32xf32> to vector<9x32xf32>
    %26 = tpu.concatenate %22, %23, %24, %25 in 0 : vector<9x32xf32>, vector<9x32xf32>, vector<9x32xf32>, vector<9x32xf32> -> vector<36x32xf32>
    %c0_14 = arith.constant 0 : index
    %c0_15 = arith.constant 0 : index
    %27 = vector.load %arg2[%c0_14, %c0_15] : memref<16x64xf32, #tpu.memory_space<vmem>>, vector<16x64xf32>
    %cst_16 = arith.constant dense<0.000000e+00> : vector<16xf32>
    %28 = vector.multi_reduction <add>, %27, %cst_16 [1] : vector<16x64xf32> to vector<16xf32>
    %29 = vector.shape_cast %28 : vector<16xf32> to vector<16x1xf32>
    %cst_17 = arith.constant 6.400000e+01 : f32
    %30 = vector.broadcast %cst_17 : f32 to vector<16x1xf32>
    %31 = arith.divf %29, %30 : vector<16x1xf32>
    %32 = vector.broadcast %31 : vector<16x1xf32> to vector<16x64xf32>
    %33 = arith.subf %27, %32 : vector<16x64xf32>
    %34 = arith.mulf %33, %33 : vector<16x64xf32>
    %cst_18 = arith.constant dense<0.000000e+00> : vector<16xf32>
    %35 = vector.multi_reduction <add>, %34, %cst_18 [1] : vector<16x64xf32> to vector<16xf32>
    %36 = vector.shape_cast %35 : vector<16xf32> to vector<16x1xf32>
    %cst_19 = arith.constant 6.400000e+01 : f32
    %37 = vector.broadcast %cst_19 : f32 to vector<16x1xf32>
    %38 = arith.divf %36, %37 : vector<16x1xf32>
    %cst_20 = arith.constant 9.99999974E-6 : f32
    %39 = vector.broadcast %cst_20 : f32 to vector<16x1xf32>
    %40 = arith.addf %38, %39 : vector<16x1xf32>
    %41 = math.rsqrt %40 : vector<16x1xf32>
    %42 = vector.broadcast %41 : vector<16x1xf32> to vector<16x64xf32>
    %43 = arith.mulf %33, %42 : vector<16x64xf32>
    %cst_21 = arith.constant dense<0.000000e+00> : vector<36xf32>
    %44 = vector.multi_reduction <add>, %26, %cst_21 [1] : vector<36x32xf32> to vector<36xf32>
    %45 = vector.shape_cast %44 : vector<36xf32> to vector<36x1xf32>
    %cst_22 = arith.constant 3.200000e+01 : f32
    %46 = vector.broadcast %cst_22 : f32 to vector<36x1xf32>
    %47 = arith.divf %45, %46 : vector<36x1xf32>
    %48 = vector.broadcast %47 : vector<36x1xf32> to vector<36x32xf32>
    %49 = arith.subf %26, %48 : vector<36x32xf32>
    %50 = arith.mulf %49, %49 : vector<36x32xf32>
    %cst_23 = arith.constant dense<0.000000e+00> : vector<36xf32>
    %51 = vector.multi_reduction <add>, %50, %cst_23 [1] : vector<36x32xf32> to vector<36xf32>
    %52 = vector.shape_cast %51 : vector<36xf32> to vector<36x1xf32>
    %cst_24 = arith.constant 3.200000e+01 : f32
    %53 = vector.broadcast %cst_24 : f32 to vector<36x1xf32>
    %54 = arith.divf %52, %53 : vector<36x1xf32>
    %cst_25 = arith.constant 9.99999974E-6 : f32
    %55 = vector.broadcast %cst_25 : f32 to vector<36x1xf32>
    %56 = arith.addf %54, %55 : vector<36x1xf32>
    %57 = math.rsqrt %56 : vector<36x1xf32>
    %58 = vector.broadcast %57 : vector<36x1xf32> to vector<36x32xf32>
    %59 = arith.mulf %49, %58 : vector<36x32xf32>
    %c0_26 = arith.constant 0 : index
    %c0_27 = arith.constant 0 : index
    %60 = vector.load %arg5[%c0_26, %c0_27] : memref<128x32xf32, #tpu.memory_space<vmem>>, vector<64x32xf32>
    %c64 = arith.constant 64 : index
    %c0_28 = arith.constant 0 : index
    %61 = vector.load %arg5[%c64, %c0_28] : memref<128x32xf32, #tpu.memory_space<vmem>>, vector<32x32xf32>
    %c96 = arith.constant 96 : index
    %c0_29 = arith.constant 0 : index
    %62 = vector.load %arg5[%c96, %c0_29] : memref<128x32xf32, #tpu.memory_space<vmem>>, vector<32x32xf32>
    %cst_30 = arith.constant dense<0.000000e+00> : vector<16x32xf32>
    %63 = tpu.matmul %43, %60, %cst_30 {dimension_numbers = #tpu.dot_dimension_numbers<[1], [0], [0], [1], [0, 0, 1, 1], [], []>} : vector<16x64xf32>, vector<64x32xf32>, vector<16x32xf32> -> vector<16x32xf32>
    %c0_31 = arith.constant 0 : index
    %c0_32 = arith.constant 0 : index
    %64 = vector.load %arg6[%c0_31, %c0_32] : memref<3x32xf32, #tpu.memory_space<vmem>>, vector<1x32xf32>
    %65 = vector.broadcast %64 : vector<1x32xf32> to vector<16x32xf32>
    %66 = arith.addf %63, %65 : vector<16x32xf32>
    %cst_33 = arith.constant dense<0.000000e+00> : vector<36x32xf32>
    %67 = tpu.matmul %59, %61, %cst_33 {dimension_numbers = #tpu.dot_dimension_numbers<[1], [0], [0], [1], [0, 0, 1, 1], [], []>} : vector<36x32xf32>, vector<32x32xf32>, vector<36x32xf32> -> vector<36x32xf32>
    %c1_34 = arith.constant 1 : index
    %c0_35 = arith.constant 0 : index
    %68 = vector.load %arg6[%c1_34, %c0_35] : memref<3x32xf32, #tpu.memory_space<vmem>>, vector<1x32xf32>
    %69 = vector.broadcast %68 : vector<1x32xf32> to vector<36x32xf32>
    %70 = arith.addf %67, %69 : vector<36x32xf32>
    %cst_36 = arith.constant dense<0.000000e+00> : vector<36x32xf32>
    %71 = tpu.matmul %59, %62, %cst_36 {dimension_numbers = #tpu.dot_dimension_numbers<[1], [0], [0], [1], [0, 0, 1, 1], [], []>} : vector<36x32xf32>, vector<32x32xf32>, vector<36x32xf32> -> vector<36x32xf32>
    %c2 = arith.constant 2 : index
    %c0_37 = arith.constant 0 : index
    %72 = vector.load %arg6[%c2, %c0_37] : memref<3x32xf32, #tpu.memory_space<vmem>>, vector<1x32xf32>
    %73 = vector.broadcast %72 : vector<1x32xf32> to vector<36x32xf32>
    %74 = arith.addf %71, %73 : vector<36x32xf32>
    %c0_38 = arith.constant 0 : index
    %c0_39 = arith.constant 0 : index
    %75 = vector.load %arg9[%c0_38, %c0_39] : memref<64x32xf32, #tpu.memory_space<vmem>>, vector<64x32xf32>
    %76 = vector.extract_strided_slice %66 {offsets = [0, 0], sizes = [8, 32], strides = [1, 1]} : vector<16x32xf32> to vector<8x32xf32>
    %77 = vector.extract_strided_slice %66 {offsets = [0, 0], sizes = [8, 32], strides = [1, 1]} : vector<16x32xf32> to vector<8x32xf32>
    %78 = vector.extract_strided_slice %66 {offsets = [0, 0], sizes = [8, 32], strides = [1, 1]} : vector<16x32xf32> to vector<8x32xf32>
    %79 = vector.extract_strided_slice %66 {offsets = [0, 0], sizes = [8, 32], strides = [1, 1]} : vector<16x32xf32> to vector<8x32xf32>
    %80 = vector.extract_strided_slice %66 {offsets = [8, 0], sizes = [8, 32], strides = [1, 1]} : vector<16x32xf32> to vector<8x32xf32>
    %81 = vector.extract_strided_slice %66 {offsets = [8, 0], sizes = [8, 32], strides = [1, 1]} : vector<16x32xf32> to vector<8x32xf32>
    %82 = vector.extract_strided_slice %66 {offsets = [8, 0], sizes = [8, 32], strides = [1, 1]} : vector<16x32xf32> to vector<8x32xf32>
    %83 = vector.extract_strided_slice %66 {offsets = [8, 0], sizes = [8, 32], strides = [1, 1]} : vector<16x32xf32> to vector<8x32xf32>
    %84 = tpu.concatenate %76, %77, %78, %79, %80, %81, %82, %83 in 0 : vector<8x32xf32>, vector<8x32xf32>, vector<8x32xf32>, vector<8x32xf32>, vector<8x32xf32>, vector<8x32xf32>, vector<8x32xf32>, vector<8x32xf32> -> vector<64x32xf32>
    %85 = arith.mulf %84, %75 : vector<64x32xf32>
    %cst_40 = arith.constant dense<0.000000e+00> : vector<64x36xf32>
    %86 = tpu.matmul %85, %70, %cst_40 {dimension_numbers = #tpu.dot_dimension_numbers<[1], [1], [0], [0], [0, 0, 1, 0], [], []>} : vector<64x32xf32>, vector<36x32xf32>, vector<64x36xf32> -> vector<64x36xf32>
    %c0_41 = arith.constant 0 : index
    %c0_42 = arith.constant 0 : index
    %87 = vector.load %arg10[%c0_41, %c0_42] : memref<64x36xf32, #tpu.memory_space<vmem>>, vector<64x36xf32>
    %88 = arith.addf %86, %87 : vector<64x36xf32>
    %cst_43 = arith.constant dense<0xFF800000> : vector<64xf32>
    %89 = vector.multi_reduction <maximumf>, %88, %cst_43 [1] : vector<64x36xf32> to vector<64xf32>
    %90 = vector.shape_cast %89 : vector<64xf32> to vector<64x1xf32>
    %91 = vector.broadcast %90 : vector<64x1xf32> to vector<64x36xf32>
    %92 = arith.subf %88, %91 : vector<64x36xf32>
    %93 = math.exp %92 : vector<64x36xf32>
    %cst_44 = arith.constant dense<0.000000e+00> : vector<64xf32>
    %94 = vector.multi_reduction <add>, %93, %cst_44 [1] : vector<64x36xf32> to vector<64xf32>
    %95 = vector.shape_cast %94 : vector<64xf32> to vector<64x1xf32>
    %96 = tpu.reciprocal %95 {approx = true} : vector<64x1xf32> -> vector<64x1xf32>
    %97 = vector.broadcast %96 : vector<64x1xf32> to vector<64x36xf32>
    %98 = arith.mulf %93, %97 : vector<64x36xf32>
    %cst_45 = arith.constant dense<0.000000e+00> : vector<64x32xf32>
    %99 = tpu.matmul %98, %74, %cst_45 {dimension_numbers = #tpu.dot_dimension_numbers<[1], [0], [0], [1], [0, 0, 1, 1], [], []>} : vector<64x36xf32>, vector<36x32xf32>, vector<64x32xf32> -> vector<64x32xf32>
    %100 = arith.mulf %99, %75 : vector<64x32xf32>
    %101 = vector.shape_cast %100 : vector<64x32xf32> to vector<2x4x8x32xf32>
    %cst_46 = arith.constant dense<0.000000e+00> : vector<2x8x32xf32>
    %102 = vector.multi_reduction <add>, %101, %cst_46 [1] : vector<2x4x8x32xf32> to vector<2x8x32xf32>
    %103 = vector.shape_cast %102 : vector<2x8x32xf32> to vector<16x32xf32>
    %c0_47 = arith.constant 0 : index
    %c0_48 = arith.constant 0 : index
    %104 = vector.load %arg7[%c0_47, %c0_48] : memref<32x64xf32, #tpu.memory_space<vmem>>, vector<32x64xf32>
    %cst_49 = arith.constant dense<0.000000e+00> : vector<16x64xf32>
    %105 = tpu.matmul %103, %104, %cst_49 {dimension_numbers = #tpu.dot_dimension_numbers<[1], [0], [0], [1], [0, 0, 1, 1], [], []>} : vector<16x32xf32>, vector<32x64xf32>, vector<16x64xf32> -> vector<16x64xf32>
    %c0_50 = arith.constant 0 : index
    %c0_51 = arith.constant 0 : index
    %106 = vector.load %arg8[%c0_50, %c0_51] : memref<1x64xf32, #tpu.memory_space<vmem>>, vector<1x64xf32>
    %107 = vector.broadcast %106 : vector<1x64xf32> to vector<16x64xf32>
    %108 = arith.addf %105, %107 : vector<16x64xf32>
    %109 = arith.addf %108, %27 : vector<16x64xf32>
    %c0_52 = arith.constant 0 : index
    %c0_53 = arith.constant 0 : index
    %110 = vector.load %arg11[%c0_52, %c0_53] : memref<16x64xf32, #tpu.memory_space<vmem>>, vector<16x64xf32>
    tpu.vector_store %arg11[%c0_52, %c0_53], %109 {strides = array<i32>} : memref<16x64xf32, #tpu.memory_space<vmem>>, vector<16x64xf32>,
    return
  }
}

</mosaic_0001>

<bundles_post_ra>
// kernel: tpu_custom_call.1
= control target key start
LH: loop header
LB: loop body
LE: loop exit
PB: predicated region body
PF: predicated region fallthrough
CT: control target
= control target key end

     0   :  { %vm76_vm0 = vcmask 64512   ;;  %v4896_v4 = vmov 0.0|0.0   ;;  %vm3456_vm1 = vmmov 0   ;;  %v4894_v8 = vmov 0.0   ;;  %s4882_s0 = inlined_call_operand.vmem [shape: f32[288,8], index: 0, kind: input, shape index: {}]   ;;  %s4883_s1 = inlined_call_operand.vmem [shape: f32[72,16], index: 1, kind: input, shape index: {}]   ;;  %s4884_s2 = inlined_call_operand.vmem [shape: f32[16,64], index: 2, kind: input, shape index: {}]   ;;  %s4885_s3 = inlined_call_operand.vmem [shape: f32[24,32], index: 3, kind: input, shape index: {}]   ;;  %s4886_s4 = inlined_call_operand.vmem [shape: f32[2,32], index: 4, kind: input, shape index: {}]   ;;  %s4887_s5 = inlined_call_operand.vmem [shape: f32[128,32], index: 5, kind: input, shape index: {}]   ;;  %s4888_s6 = inlined_call_operand.vmem [shape: f32[3,32], index: 6, kind: input, shape index: {}]   ;;  %s4889_s7 = inlined_call_operand.vmem [shape: f32[32,64], index: 7, kind: input, shape index: {}]   ;;  %s4890_s8 = inlined_call_operand.vmem [shape: f32[1,64], index: 8, kind: input, shape index: {}]   ;;  %s4891_s9 = inlined_call_operand.vmem [shape: f32[64,32], index: 9, kind: input, shape index: {}]   ;;  %s4892_s10 = inlined_call_operand.vmem [shape: f32[64,36], index: 10, kind: input, shape index: {}]   ;;  %s4893_s11 = inlined_call_operand.hbm [shape: f32[16,64], index: 11, kind: output, shape index: {}]  }
   0x1   :  { %v75_v0 = vld [vmem:[%s4885_s3] sm:$0xff]  ;;  %v40_v2 = vld [vmem:[%s4882_s0 + $0x8] sm:$0xff]  ;;  %v41_v3 = vld [vmem:[%s4882_s0 + $0x10] sm:$0xff]  ;;  %3315 = vmatprep.subr.bf16.mxu1 %v4896_v4  ;;  %3168 = vmatprep.mubr.msk.f32.mxu1 %vm3456_vm1, %v4894_v8  ;;  %vm1204_vm2 = vcmask 130048   ;;  %vm1988_vm3 = vcmask 523264  }
   0x2   :  { %v39_v1 = vld [vmem:[%s4882_s0] sm:$0xff]  ;;  %3108 = vmatprep.subr.mxu0 %v75_v0  ;;  %v1202_v5 = vld [vmem:[%s4885_s3 + $0x8] sm:$0xff]  ;;  %v1203_v6 = vld [vmem:[%s4885_s3 + $0x10] sm:$0xff] }
   0x3   :  { %3110 = vmatprep.mubr.msk.f32.mxu0 %vm76_vm0, %v39_v1  ;;  %3109 = vmatpush3.msra.mxu0 %v75_v0  ;;  %v3316_v7 = vpack.c.bf16 %v1203_v6, %v1202_v5  ;;  %v42_v9 = vld [vmem:[%s4882_s0 + $0x18] sm:$0xff]  ;;  %v43_v10 = vld [vmem:[%s4882_s0 + $0x20] sm:$0xff]  ;;  %v44_v12 = vld [vmem:[%s4882_s0 + $0x28] sm:$0xff] }
   0x4   :  { %3111 = vmatmul.mubr.msk.f32.vlgmr.msra.gmra.mrb[0].mxu0 %vm76_vm0, %v40_v2  ;;  %v1193_v11 = vld [vmem:[%s4883_s1] sm:$0xff]  ;;  %v45_v13 = vld [vmem:[%s4882_s0 + $0x30] sm:$0xff]  ;;  %v1194_v14 = vld [vmem:[%s4883_s1 + $0x8] sm:$0xff] }
   0x5   :  { %3113 = vmatprep.mubr.msk.f32.mxu0 %vm76_vm0, %v41_v3  ;;  %3317 = vmatpush3.bf16.msra.mxu1 %v3316_v7  ;;  %v46_v15 = vld [vmem:[%s4882_s0 + $0x38] sm:$0xff]  ;;  %v47_v16 = vld [vmem:[%s4882_s0 + $0x40] sm:$0xff]  ;;  %v1195_v17 = vld [vmem:[%s4883_s1 + $0x10] sm:$0xff] }
   0x6   :  { %v48_v18 = vld [vmem:[%s4882_s0 + $0x48] sm:$0xff]  ;;  %v1986_v19 = vld [vmem:[%s4884_s2] sm:$0xff] }
   0x7   :  { %v1987_v20 = vld [vmem:[%s4884_s2 + $0x8] sm:$0xff] }
   0x8   :  { %3114 = vmatmul.mubr.msk.f32.gmra.mrb[2].mxu0 %vm76_vm0, %v42_v9  ;;  %3169 = vmatmul.mubr.msk.f32.vlgmr.msra.gmra.mrb[0].mxu1 %vm1204_vm2, %v1193_v11 }
   0x9   :  { %3116 = vmatprep.mubr.msk.f32.mxu0 %vm76_vm0, %v43_v10  ;;  %3171 = vmatprep.mubr.msk.f32.mxu1 %vm3456_vm1, %v4894_v8 }
   0xc   :  { %3117 = vmatmul.mubr.msk.f32.gmra.mrb[4].mxu0 %vm76_vm0, %v44_v12  ;;  %3172 = vmatmul.mubr.msk.f32.gmra.mrb[2].mxu1 %vm1204_vm2, %v1194_v14 }
   0xd   :  { %3119 = vmatprep.mubr.msk.f32.mxu0 %vm76_vm0, %v45_v13  ;;  %3174 = vmatprep.mubr.msk.f32.mxu1 %vm3456_vm1, %v4894_v8 }
  0x10   :  { %3120 = vmatmul.mubr.msk.f32.gmra.mrb[6].mxu0 %vm76_vm0, %v46_v15  ;;  %3175 = vmatmul.mubr.msk.f32.gmra.mrb[4].mxu1 %vm1204_vm2, %v1195_v17 }
  0x11   :  { %3122 = vmatprep.mubr.msk.f32.mxu0 %vm76_vm0, %v47_v16 }
  0x12   :  { %16 = vsyncpa [#allocation3], 0  ;;  %v49_v21 = vld [vmem:[%s4882_s0 + $0x50] sm:$0xff]  ;;  %3177 = vmatprep.mubr.msk.f32.mxu1 %vm3456_vm1, %v4894_v8  ;;  %v1196_v22 = vld [vmem:[%s4883_s1 + $0x18] sm:$0xff]  ;;  %v1989_v23 = vsel %vm1988_vm3, %v1986_v19, 0.0  ;;  %v1992_v24 = vsel %vm1988_vm3, %v1987_v20, 0.0  ;;  %v1355_v58 = vlaneseq }
  0x13   :  { %1990 = vadd.xlane.f32.xlu0 %v1989_v23  ;;  %v50_v25 = vld [vmem:[%s4882_s0 + $0x58] sm:$0xff]  ;;  %v51_v26 = vld [vmem:[%s4882_s0 + $0x60] sm:$0xff]  ;;  %v52_v28 = vld [vmem:[%s4882_s0 + $0x68] sm:$0xff]  ;;  %vm538_vm4 = vcmask 257024   ;;  %v3458_v55 = vmov 1983009808  }
  0x14   :  { %3123 = vmatmul.mubr.msk.f32.gmra.mrb[8].mxu0 %vm76_vm0, %v48_v18  ;;  %3178 = vmatmul.mubr.msk.f32.gmra.mrb[6].mxu1 %vm1204_vm2, %v1196_v22  ;;  %v1197_v27 = vld [vmem:[%s4883_s1 + $0x20] sm:$0xff]  ;;  %v53_v29 = vld [vmem:[%s4882_s0 + $0x70] sm:$0xff]  ;;  %v1198_v30 = vld [vmem:[%s4883_s1 + $0x28] sm:$0xff]  ;;  %v3738_v56 = vunpack.c.l.s4 %v3458_v55  ;;  %vm1043_vm5 = vcmask 261120   ;;  %v3745_v10 = vshrl.u32 %v1355_v58, 7  ;;  %vm1540_vm6 = vcmask 254976  }
  0x15   :  { %3125 = vmatprep.mubr.msk.f32.mxu0 %vm76_vm0, %v49_v21  ;;  %3180 = vmatprep.mubr.msk.f32.mxu1 %vm3456_vm1, %v4894_v8  ;;  %v54_v31 = vld [vmem:[%s4882_s0 + $0x78] sm:$0xff]  ;;  %v55_v32 = vld [vmem:[%s4882_s0 + $0x80] sm:$0xff]  ;;  %v1199_v33 = vld [vmem:[%s4883_s1 + $0x30] sm:$0xff]  ;;  %vm1880_vm7 = vcmask 1041409   ;;  %vm1883_vm8 = vcmask 1042434   ;;  %vm1886_vm9 = vcmask 1043459  }
  0x16   :  { %v56_v34 = vld [vmem:[%s4882_s0 + $0x88] sm:$0xff]  ;;  %v57_v35 = vld [vmem:[%s4882_s0 + $0x90] sm:$0xff]  ;;  %v1200_v36 = vld [vmem:[%s4883_s1 + $0x38] sm:$0xff]  ;;  %v1354_v3 = vunpack.c.0.s8 %v3738_v56  ;;  %vm1889_vm10 = vcmask 1044484   ;;  %vm1892_vm11 = vcmask 1045509   ;;  %vm1895_vm12 = vcmask 1046534  }
  0x17   :  { %1993 = vadd.xlane.f32.xlu0 %v1992_v24  ;;  %v58_v37 = vld [vmem:[%s4882_s0 + $0x98] sm:$0xff]  ;;  %v59_v38 = vld [vmem:[%s4882_s0 + $0xa0] sm:$0xff]  ;;  %v60_v40 = vld [vmem:[%s4882_s0 + $0xa8] sm:$0xff]  ;;  %vm1898_vm13 = vcmask 1047559   ;;  %vm1980_vm14 = vcmask 1040384   ;;  %vm1982_vm15 = vcmask 1041408  }
  0x18   :  { %3126 = vmatmul.mubr.msk.f32.gmra.mrb[10].mxu0 %vm76_vm0, %v50_v25  ;;  %3181 = vmatmul.mubr.msk.f32.gmra.mrb[8].mxu1 %vm1204_vm2, %v1197_v27  ;;  %v1201_v39 = vld [vmem:[%s4883_s1 + $0x40] sm:$0xff]  ;;  %v61_v41 = vld [vmem:[%s4882_s0 + $0xb0] sm:$0xff]  ;;  %v62_v42 = vld [vmem:[%s4882_s0 + $0xb8] sm:$0xff]  ;;  %s3459_s25 = smov [#allocation2]  }
  0x19   :  { %3128 = vmatprep.mubr.msk.f32.mxu0 %vm76_vm0, %v51_v26  ;;  %3183 = vmatprep.mubr.msk.f32.mxu1 %vm3456_vm1, %v4894_v8  ;;  %v63_v43 = vld [vmem:[%s4882_s0 + $0xc0] sm:$0xff]  ;;  %v64_v44 = vld [vmem:[%s4882_s0 + $0xc8] sm:$0xff]  ;;  %v65_v45 = vld [vmem:[%s4882_s0 + $0xd0] sm:$0xff]  ;;  %s2902_s26 = sshll.u32 %s3459_s25, 4  ;;  %s2903_s26 = int_to_ptr.vmem [resolvable:$true] %s2902_s26 }
  0x1a   :  { %v66_v46 = vld [vmem:[%s4882_s0 + $0xd8] sm:$0xff]  ;;  %v67_v47 = vld [vmem:[%s4882_s0 + $0xe0] sm:$0xff]  ;;  %v68_v48 = vld [vmem:[%s4882_s0 + $0xe8] sm:$0xff]  ;;  %s3431_s27 = scalar_lea.vmem %s2903_s26, 256  ;;  %p3436_p1 = scmp.lt.s32.totalorder %s2903_s26, %s2903_s26 }
  0x1b   :  { %v69_v49 = vld [vmem:[%s4882_s0 + $0xf0] sm:$0xff]  ;;  %v70_v50 = vld [vmem:[%s4882_s0 + $0xf8] sm:$0xff]  ;;  %v71_v51 = vld [vmem:[%s4882_s0 + $0x100] sm:$0xff]  ;;  %p3432_p0 = scmp.ne.s32.totalorder %s2903_s26, %s3431_s27  ;;  %p3437_p2 = scmp.lt.s32.totalorder %s3431_s27, %s3431_s27 }
  0x1c   :  { %3129 = vmatmul.mubr.msk.f32.gmra.mrb[12].mxu0 %vm76_vm0, %v52_v28  ;;  %3184 = vmatmul.mubr.msk.f32.gmra.mrb[10].mxu1 %vm1204_vm2, %v1198_v30  ;;  %v72_v52 = vld [vmem:[%s4882_s0 + $0x108] sm:$0xff]  ;;  %v73_v53 = vld [vmem:[%s4882_s0 + $0x110] sm:$0xff]  ;;  %v74_v54 = vld [vmem:[%s4882_s0 + $0x118] sm:$0xff] }
  0x1d   :  { %3131 = vmatprep.mubr.msk.f32.mxu0 %vm76_vm0, %v53_v29  ;;  %3186 = vmatprep.mubr.msk.f32.mxu1 %vm3456_vm1, %v4894_v8  ;;  %p3438_p3 = por %p3437_p2, %p3436_p1 }
  0x1f   :  { %p3439_p4 = pnand %p3438_p3, %p3432_p0 }
  0x20   :  { %3132 = vmatmul.mubr.msk.f32.gmra.mrb[14].mxu0 %vm76_vm0, %v54_v31  ;;  %3187 = vmatmul.mubr.msk.f32.gmra.mrb[12].mxu1 %vm1204_vm2, %v1199_v33 }
  0x21   :  { %3134 = vmatprep.mubr.msk.f32.mxu0 %vm76_vm0, %v55_v32  ;;  %3189 = vmatprep.mubr.msk.f32.mxu1 %vm3456_vm1, %v4894_v8 }
  0x24   :  { %3135 = vmatmul.mubr.msk.f32.gmra.mrb[16].mxu0 %vm76_vm0, %v56_v34  ;;  %3190 = vmatmul.mubr.msk.f32.gmra.mrb[14].mxu1 %vm1204_vm2, %v1200_v36 }
  0x25   :  { %3137 = vmatprep.mubr.msk.f32.mxu0 %vm76_vm0, %v57_v35  ;;  %3192 = vmatprep.mubr.msk.f32.mxu1 %vm3456_vm1, %v4894_v8 }
  0x28   :  { %3138 = vmatmul.mubr.msk.f32.gmra.mrb[18].mxu0 %vm76_vm0, %v58_v37  ;;  %3193 = vmatmul.mubr.msk.f32.gmra.mrb[16].mxu1 %vm1204_vm2, %v1201_v39  ;;  %vm2670_vm2 = vcmask 1043456  }
  0x29   :  { %3140 = vmatprep.mubr.msk.f32.mxu0 %vm76_vm0, %v59_v38 }
  0x2c   :  { %3141 = vmatmul.mubr.msk.f32.gmra.mrb[20].mxu0 %vm76_vm0, %v60_v40 }
  0x2d   :  { %3143 = vmatprep.mubr.msk.f32.mxu0 %vm76_vm0, %v61_v41 }
  0x30   :  { %3144 = vmatmul.mubr.msk.f32.gmra.mrb[22].mxu0 %vm76_vm0, %v62_v42 }
  0x31   :  { %3146 = vmatprep.mubr.msk.f32.mxu0 %vm76_vm0, %v63_v43 }
  0x34   :  { %3147 = vmatmul.mubr.msk.f32.gmra.mrb[24].mxu0 %vm76_vm0, %v64_v44 }
  0x35   :  { %3149 = vmatprep.mubr.msk.f32.mxu0 %vm76_vm0, %v65_v45 }
  0x38   :  { %3150 = vmatmul.mubr.msk.f32.gmra.mrb[26].mxu0 %vm76_vm0, %v66_v46 }
  0x39   :  { %3152 = vmatprep.mubr.msk.f32.mxu0 %vm76_vm0, %v67_v47 }
  0x3c   :  { %3153 = vmatmul.mubr.msk.f32.gmra.mrb[28].mxu0 %vm76_vm0, %v68_v48 }
  0x3d   :  { %3155 = vmatprep.mubr.msk.f32.mxu0 %vm76_vm0, %v69_v49 }
  0x40   :  { %3156 = vmatmul.mubr.msk.f32.gmra.mrb[30].mxu0 %vm76_vm0, %v70_v50 }
  0x41   :  { %3158 = vmatprep.mubr.msk.f32.mxu0 %vm76_vm0, %v71_v51 }
  0x44   :  { %3159 = vmatmul.mubr.msk.f32.gmra.mrb[32].mxu0 %vm76_vm0, %v72_v52 }
  0x45   :  { %3161 = vmatprep.mubr.msk.f32.mxu0 %vm76_vm0, %v73_v53 }
  0x48   :  { %3162 = vmatmul.mubr.msk.f32.gmra.mrb[34].mxu0 %vm76_vm0, %v74_v54  ;;  %vm1984_vm0 = vcmask 1042432  }
  0xd7   :  { %v3112_v57 = vpop.f32.mrb[0].mxu0 }
  0xd8   :  { %v467_v59 = vcombine.high %v3112_v57, %v3112_v57  ;;  %v553_v60 = vsel %vm538_vm4, %v3112_v57, -inf  ;;  %v251_v61 = vpop.f32.mrb[1].mxu0 }
  0xd9   :  { %v554_v62 = vrot.slane %v553_v60, 4  ;;  %v466_v63 = vcombine.high %v251_v61, %v251_v61  ;;  %v539_v0 = vsel %vm538_vm4, %v251_v61, -inf }
  0xda   :  { %v560_v1 = vsel %vm538_vm4, %v467_v59, -inf  ;;  %v540_v2 = vrot.slane %v539_v0, 4 }
  0xdb   :  { %v555_v5 = vmax.f32 %v553_v60, %v554_v62  ;;  %v561_v6 = vrot.slane %v560_v1, 4  ;;  %v546_v7 = vsel %vm538_vm4, %v466_v63, -inf  ;;  %v3115_v9 = vpop.f32.mrb[2].mxu0  ;;  %v3748_v16 = vpop.f32.mrb[0].mxu1 }
  0xdc   :  { %v541_v11 = vmax.f32 %v539_v0, %v540_v2  ;;  %v547_v12 = vrot.slane %v546_v7, 4  ;;  %v469_v13 = vcombine.high %v3115_v9, %v3115_v9  ;;  %v581_v14 = vsel %vm538_vm4, %v3115_v9, -inf  ;;  %v261_v15 = vpop.f32.mrb[3].mxu0  ;;  %v3170_v21 = vpop.f32.mrb[1].mxu1 }
  0xdd   :  { %v556_v17 = vrot.slane %v555_v5, 2  ;;  %v562_v18 = vmax.f32 %v560_v1, %v561_v6  ;;  %v582_v19 = vrot.slane %v581_v14, 4  ;;  %v468_v20 = vcombine.high %v261_v15, %v261_v15 }
  0xde   :  { %v542_v22 = vrot.slane %v541_v11, 2  ;;  %v548_v23 = vmax.f32 %v546_v7, %v547_v12  ;;  %v588_v24 = vsel %vm538_vm4, %v469_v13, -inf  ;;  %v567_v25 = vsel %vm538_vm4, %v261_v15, -inf }
  0xdf   :  { %v557_v26 = vmax.f32 %v555_v5, %v556_v17  ;;  %v563_v27 = vrot.slane %v562_v18, 2  ;;  %v583_v28 = vmax.f32 %v581_v14, %v582_v19  ;;  %v589_v29 = vrot.slane %v588_v24, 4  ;;  %v3118_v30 = vpop.f32.mrb[4].mxu0  ;;  %v3755_v36 = vpop.f32.mrb[2].mxu1 }
  0xe0   :  { %v543_v31 = vmax.f32 %v541_v11, %v542_v22  ;;  %v549_v32 = vrot.slane %v548_v23, 2  ;;  %v568_v33 = vrot.slane %v567_v25, 4  ;;  %v574_v34 = vsel %vm538_vm4, %v468_v20, -inf  ;;  %v3753_v35 = vpop.f32.mrb[5].mxu0  ;;  %v3173_v41 = vpop.f32.mrb[3].mxu1 }
  0xe1   :  { %v558_v37 = vrot.slane %v557_v26, 1  ;;  %v564_v38 = vmax.f32 %v562_v18, %v563_v27  ;;  %v584_v39 = vrot.slane %v583_v28, 2  ;;  %v590_v40 = vmax.f32 %v588_v24, %v589_v29 }
  0xe2   :  { %v544_v42 = vrot.slane %v543_v31, 1  ;;  %v550_v43 = vmax.f32 %v548_v23, %v549_v32  ;;  %v569_v44 = vmax.f32 %v567_v25, %v568_v33  ;;  %v575_v45 = vrot.slane %v574_v34, 4 }
  0xe3   :  { %v559_v46 = vmax.f32 %v557_v26, %v558_v37  ;;  %v565_v47 = vrot.slane %v564_v38, 1  ;;  %v585_v48 = vmax.f32 %v583_v28, %v584_v39  ;;  %v591_v49 = vrot.slane %v590_v40, 2  ;;  %v3757_v50 = vpop.f32.mrb[6].mxu0  ;;  %v3761_v57 = vpop.f32.mrb[4].mxu1 }
  0xe4   :  { %v545_v51 = vmax.f32 %v543_v31, %v544_v42  ;;  %v551_v52 = vrot.slane %v550_v43, 1  ;;  %v570_v53 = vrot.slane %v569_v44, 2  ;;  %v576_v54 = vmax.f32 %v574_v34, %v575_v45  ;;  %v3759_v55 = vpop.f32.mrb[7].mxu0  ;;  %v3176_v62 = vpop.f32.mrb[5].mxu1 }
  0xe5   :  { %v566_v58 = vmax.f32 %v564_v38, %v565_v47  ;;  %v3764_v59 = vsel %vm1043_vm5, %v559_v46, -inf  ;;  %v586_v60 = vrot.slane %v585_v48, 1  ;;  %v592_v61 = vmax.f32 %v590_v40, %v591_v49 }
  0xe6   :  { %v552_v63 = vmax.f32 %v550_v43, %v551_v52  ;;  %v1044_v0 = vsel %vm1043_vm5, %v545_v51, -inf  ;;  %v571_v1 = vmax.f32 %v569_v44, %v570_v53  ;;  %v577_v2 = vrot.slane %v576_v54, 2 }
  0xe7   :  { %v1045_v5 = vsel %vm1043_vm5, %v566_v58, -inf  ;;  %v587_v6 = vmax.f32 %v585_v48, %v586_v60  ;;  %v593_v7 = vrot.slane %v592_v61, 1  ;;  %v471_v9 = vcombine.high %v3118_v30, %v3118_v30  ;;  %v3768_v11 = vpop.f32.mrb[8].mxu0  ;;  %v3773_v18 = vpop.f32.mrb[6].mxu1 }
  0xe8   :  { %v1046_v12 = vmax.f32 %v1044_v0, %v1045_v5  ;;  %v572_v13 = vrot.slane %v571_v1, 1  ;;  %v578_v14 = vmax.f32 %v576_v54, %v577_v2  ;;  %v1051_v15 = vsel %vm1043_vm5, %v552_v63, -inf  ;;  %v3771_v17 = vpop.f32.mrb[9].mxu0  ;;  %v3179_v23 = vpop.f32.mrb[7].mxu1 }
  0xe9   :  { %v594_v19 = vmax.f32 %v592_v61, %v593_v7  ;;  %v1047_v20 = vsel %vm1043_vm5, %v587_v6, -inf  ;;  %v609_v21 = vsel %vm538_vm4, %v3118_v30, -inf  ;;  %v616_v22 = vsel %vm538_vm4, %v471_v9, -inf }
  0xea   :  { %v3778_v24 = vmax.f32 %v1046_v12, %v1047_v20  ;;  %v573_v25 = vmax.f32 %v571_v1, %v572_v13  ;;  %v579_v26 = vrot.slane %v578_v14, 1  ;;  %v610_v27 = vrot.slane %v609_v21, 4 }
  0xeb   :  { %v1054_v28 = vsel %vm1043_vm5, %v594_v19, -inf  ;;  %v617_v29 = vrot.slane %v616_v22, 4  ;;  %v470_v31 = vcombine.high %v3753_v35, %v3753_v35  ;;  %v595_v32 = vsel %vm538_vm4, %v3753_v35, -inf  ;;  %v3785_v33 = vpop.f32.mrb[10].mxu0  ;;  %v3790_v40 = vpop.f32.mrb[8].mxu1 }
  0xec   :  { %v580_v30 = vmax.f32 %v578_v14, %v579_v26  ;;  %v1052_v34 = vsel %vm1043_vm5, %v573_v25, -inf  ;;  %v611_v37 = vmax.f32 %v609_v21, %v610_v27  ;;  %v596_v38 = vrot.slane %v595_v32, 4  ;;  %v3788_v39 = vpop.f32.mrb[11].mxu0  ;;  %v3182_v45 = vpop.f32.mrb[9].mxu1 }
  0xed   :  { %v1053_v41 = vmax.f32 %v1051_v15, %v1052_v34  ;;  %v618_v42 = vmax.f32 %v616_v22, %v617_v29  ;;  %v602_v43 = vsel %vm538_vm4, %v470_v31, -inf  ;;  %v473_v44 = vcombine.high %v3757_v50, %v3757_v50 }
  0xee   :  { %v1059_v35 = vsel %vm1043_vm5, %v580_v30, -inf  ;;  %v612_v46 = vrot.slane %v611_v37, 2  ;;  %v597_v47 = vmax.f32 %v595_v32, %v596_v38  ;;  %v603_v48 = vrot.slane %v602_v43, 4  ;;  %v3819_v32 = vld [vmem:[%s4886_s4] ss:$0 sm:$0xff] }
  0xef   :  { %v619_v49 = vrot.slane %v618_v42, 2  ;;  %v1055_v51 = vmax.f32 %v1053_v41, %v1054_v28  ;;  %v1060_v52 = vmax.f32 %v3764_v59, %v1059_v35  ;;  %v637_v53 = vsel %vm538_vm4, %v3757_v50, -inf  ;;  %v3799_v54 = vpop.f32.mrb[12].mxu0  ;;  %v3808_v9 = vpop.f32.mrb[10].mxu1 }
  0xf0   :  { %v613_v58 = vmax.f32 %v611_v37, %v612_v46  ;;  %v598_v60 = vrot.slane %v597_v47, 2  ;;  %v604_v61 = vmax.f32 %v602_v43, %v603_v48  ;;  %v638_v62 = vrot.slane %v637_v53, 4  ;;  %v3801_v63 = vpop.f32.mrb[13].mxu0  ;;  %v3185_v20 = vpop.f32.mrb[11].mxu1 }
  0xf1   :  { %v620_v0 = vmax.f32 %v618_v42, %v619_v49  ;;  %v644_v1 = vsel %vm538_vm4, %v473_v44, -inf  ;;  %v472_v2 = vcombine.high %v3759_v55, %v3759_v55  ;;  %v623_v59 = vsel %vm538_vm4, %v3759_v55, -inf }
  0xf2   :  { %v614_v5 = vrot.slane %v613_v58, 1  ;;  %v599_v6 = vmax.f32 %v597_v47, %v598_v60  ;;  %v605_v50 = vrot.slane %v604_v61, 2  ;;  %v639_v7 = vmax.f32 %v637_v53, %v638_v62 }
  0xf3   :  { %v621_v12 = vrot.slane %v620_v0, 1  ;;  %v645_v13 = vrot.slane %v644_v1, 4  ;;  %v624_v14 = vrot.slane %v623_v59, 4  ;;  %v630_v15 = vsel %vm538_vm4, %v472_v2, -inf  ;;  %v3811_v19 = vpop.f32.mrb[14].mxu0 }
  0xf4   :  { %v615_v21 = vmax.f32 %v613_v58, %v614_v5  ;;  %v600_v22 = vrot.slane %v599_v6, 1  ;;  %v606_v23 = vmax.f32 %v604_v61, %v605_v50  ;;  %v640_v25 = vrot.slane %v639_v7, 2  ;;  %v3813_v26 = vpop.f32.mrb[15].mxu0 }
  0xf5   :  { %v622_v55 = vmax.f32 %v620_v0, %v621_v12  ;;  %v646_v27 = vmax.f32 %v644_v1, %v645_v13  ;;  %v625_v28 = vmax.f32 %v623_v59, %v624_v14  ;;  %v631_v29 = vrot.slane %v630_v15, 4 }
  0xf6   :  { %v1056_v31 = vsel %vm1043_vm5, %v615_v21, -inf  ;;  %v601_v30 = vmax.f32 %v599_v6, %v600_v22  ;;  %v607_v34 = vrot.slane %v606_v23, 1  ;;  %v641_v37 = vmax.f32 %v639_v7, %v640_v25 }
  0xf7   :  { %v1057_v38 = vmax.f32 %v1055_v51, %v1056_v31  ;;  %v1063_v41 = vsel %vm1043_vm5, %v622_v55, -inf  ;;  %v647_v42 = vrot.slane %v646_v27, 2  ;;  %v626_v43 = vrot.slane %v625_v28, 2  ;;  %v3822_v44 = vpop.f32.mrb[16].mxu0 }
  0xf8   :  { %v608_v45 = vmax.f32 %v606_v23, %v607_v34  ;;  %v1061_v35 = vsel %vm1043_vm5, %v601_v30, -inf  ;;  %v642_v46 = vrot.slane %v641_v37, 1  ;;  %v632_v47 = vmax.f32 %v630_v15, %v631_v29  ;;  %v3825_v48 = vpop.f32.mrb[17].mxu0 }
  0xf9   :  { %v3828_v49 = vadd.f32 %v3819_v32, %v1057_v38  ;;  %v1062_v53 = vmax.f32 %v1060_v52, %v1061_v35  ;;  %v648_v58 = vmax.f32 %v646_v27, %v647_v42  ;;  %v627_v60 = vmax.f32 %v625_v28, %v626_v43 }
  0xfa   :  { %v1049_v51 = vsel %vm1043_vm5, %v608_v45, -inf  ;;  %v643_v61 = vmax.f32 %v641_v37, %v642_v46  ;;  %v633_v62 = vrot.slane %v632_v47, 2  ;;  %v475_v0 = vcombine.high %v3768_v11, %v3768_v11 }
  0xfb   :  { %v1050_v1 = vmax.f32 %v3778_v24, %v1049_v51  ;;  %v1064_v2 = vmax.f32 %v1062_v53, %v1063_v41  ;;  %v649_v59 = vrot.slane %v648_v58, 1  ;;  %v3837_v5 = vsub.s32 %v1354_v3, %v3745_v10  ;;  %v3839_v6 = vpop.f32.mrb[18].mxu0 }
  0xfc   :  { %v628_v52 = vrot.slane %v627_v60, 1  ;;  %v634_v50 = vmax.f32 %v632_v47, %v633_v62  ;;  %v665_v7 = vsel %vm538_vm4, %v3768_v11, -inf  ;;  %v3843_v12 = vpop.f32.mrb[19].mxu0  ;;  %v3847_v14 = vsel %vm1043_vm5, %v643_v61, -inf }
  0xfd   :  { %v650_v24 = vmax.f32 %v648_v58, %v649_v59  ;;  %v666_v15 = vrot.slane %v665_v7, 4  ;;  %v672_v10 = vsel %vm538_vm4, %v475_v0, -inf  ;;  %v474_v20 = vcombine.high %v3771_v17, %v3771_v17  ;;  %v3878_v0 = vpop.f32.mrb[12].mxu1 }
  0xfe   :  { %v629_v56 = vmax.f32 %v627_v60, %v628_v52  ;;  %v635_v3 = vrot.slane %v634_v50, 1  ;;  %v3853_v21 = vadd.f32 %v3819_v32, %v1050_v1  ;;  %v673_v23 = vrot.slane %v672_v10, 4  ;;  %v3188_v52 = vpop.f32.mrb[13].mxu1 }
  0xff   :  { %v1066_v11 = vsel %vm1043_vm5, %v650_v24, -inf  ;;  %v667_v22 = vmax.f32 %v665_v7, %v666_v15  ;;  %v3856_v25 = vpop.f32.mrb[20].mxu0  ;;  %v651_v28 = vsel %vm538_vm4, %v3771_v17, -inf  ;;  %v658_v29 = vsel %vm538_vm4, %v474_v20, -inf }
 0x100   :  { %v636_v55 = vmax.f32 %v634_v50, %v635_v3  ;;  %v1065_v27 = vsel %vm1043_vm5, %v629_v56, -inf  ;;  %v3862_v31 = vpop.f32.mrb[21].mxu0  ;;  %v674_v37 = vmax.f32 %v672_v10, %v673_v23  ;;  %v652_v38 = vrot.slane %v651_v28, 4 }
 0x101   :  { %v1067_v30 = vmax.f32 %v1065_v27, %v1066_v11  ;;  %v668_v34 = vrot.slane %v667_v22, 2  ;;  %v3865_v41 = vadd.f32 %v3819_v32, %v1064_v2  ;;  %v659_v42 = vrot.slane %v658_v29, 4 }
 0x102   :  { %v1351_v43 = vcombine.high %v3748_v16, %v3748_v16  ;;  %v1358_v45 = vrot.slane %v3748_v16, %v3837_v5  ;;  %v675_v17 = vrot.slane %v674_v37, 2  ;;  %v653_v46 = vmax.f32 %v651_v28, %v652_v38 }
 0x103   :  { %v669_v35 = vmax.f32 %v667_v22, %v668_v34  ;;  %v1072_v47 = vsel %vm1043_vm5, %v636_v55, -inf  ;;  %v3872_v53 = vpop.f32.mrb[22].mxu0  ;;  %v660_v58 = vmax.f32 %v658_v29, %v659_v42 }
 0x104   :  { %v1365_v60 = vrot.slane %v1351_v43, %v3837_v5  ;;  %v1366_v51 = vcombine.high %v1358_v45, %v1358_v45  ;;  %v1541_v61 = vsel %vm1540_vm6, %v1358_v45, -inf  ;;  %v3876_v62 = vpop.f32.mrb[23].mxu0  ;;  %v676_v2 = vmax.f32 %v674_v37, %v675_v17 }
 0x105   :  { %v670_v1 = vrot.slane %v669_v35, 1  ;;  %v654_v16 = vrot.slane %v653_v46, 2  ;;  %v1542_v59 = vrot.slane %v1541_v61, 4  ;;  %v661_v50 = vrot.slane %v660_v58, 2 }
 0x106   :  { %v1367_v7 = vcombine.high %v1365_v60, %v1365_v60  ;;  %v1548_v24 = vsel %vm1540_vm6, %v1366_v51, -inf  ;;  %v1555_v15 = vsel %vm1540_vm6, %v1365_v60, -inf  ;;  %v677_v3 = vrot.slane %v676_v2, 1 }
 0x107   :  { %v671_v56 = vmax.f32 %v669_v35, %v670_v1  ;;  %v655_v10 = vmax.f32 %v653_v46, %v654_v16  ;;  %v1543_v20 = vmax.f32 %v1541_v61, %v1542_v59  ;;  %v3882_v11 = vpop.f32.mrb[24].mxu0  ;;  %v662_v22 = vmax.f32 %v660_v58, %v661_v50 }
 0x108   :  { %v1549_v23 = vrot.slane %v1548_v24, 4  ;;  %v1556_v55 = vrot.slane %v1555_v15, 4  ;;  %v1562_v27 = vsel %vm1540_vm6, %v1367_v7, -inf  ;;  %v3885_v28 = vpop.f32.mrb[25].mxu0  ;;  %v678_v29 = vmax.f32 %v676_v2, %v677_v3 }
 0x109   :  { %v1068_v34 = vsel %vm1043_vm5, %v671_v56, -inf  ;;  %v656_v37 = vrot.slane %v655_v10, 1  ;;  %v1544_v38 = vrot.slane %v1543_v20, 2  ;;  %v663_v43 = vrot.slane %v662_v22, 1 }
 0x10a   :  { %v3888_v42 = vmax.f32 %v1067_v30, %v1068_v34  ;;  %v1550_v45 = vmax.f32 %v1548_v24, %v1549_v23  ;;  %v1557_v35 = vmax.f32 %v1555_v15, %v1556_v55  ;;  %v1563_v60 = vrot.slane %v1562_v27, 4 }
 0x10b   :  { %v657_v17 = vmax.f32 %v655_v10, %v656_v37  ;;  %v1545_v46 = vmax.f32 %v1543_v20, %v1544_v38  ;;  %v477_v58 = vcombine.high %v3785_v33, %v3785_v33  ;;  %v3892_v51 = vpop.f32.mrb[26].mxu0  ;;  %v1075_v61 = vsel %vm1043_vm5, %v678_v29, -inf }
 0x10c   :  { %v1551_v1 = vrot.slane %v1550_v45, 2  ;;  %v1558_v2 = vrot.slane %v1557_v35, 2  ;;  %v693_v16 = vsel %vm538_vm4, %v3785_v33, -inf  ;;  %v1564_v52 = vmax.f32 %v1562_v27, %v1563_v60  ;;  %v3901_v33 = vpop.f32.mrb[27].mxu0 }
 0x10d   :  { %v1073_v30 = vsel %vm1043_vm5, %v657_v17, -inf  ;;  %v1546_v59 = vrot.slane %v1545_v46, 1  ;;  %v694_v50 = vrot.slane %v693_v16, 4  ;;  %v664_v7 = vmax.f32 %v662_v22, %v663_v43 }
 0x10e   :  { %v1074_v24 = vmax.f32 %v1072_v47, %v1073_v30  ;;  %v1552_v15 = vmax.f32 %v1550_v45, %v1551_v1  ;;  %v1559_v56 = vmax.f32 %v1557_v35, %v1558_v2  ;;  %v1565_v10 = vrot.slane %v1564_v52, 2 }
 0x10f   :  { %v1547_v3 = vmax.f32 %v1545_v46, %v1546_v59  ;;  %v695_v20 = vmax.f32 %v693_v16, %v694_v50  ;;  %v700_v23 = vsel %vm538_vm4, %v477_v58, -inf  ;;  %v1368_v47 = vcombine.high %v3755_v36, %v3755_v36 }
 0x110   :  { %v1553_v55 = vrot.slane %v1552_v15, 1  ;;  %v1560_v29 = vrot.slane %v1559_v56, 1  ;;  %v701_v34 = vrot.slane %v700_v23, 4  ;;  %v3899_v37 = vmax.f32 %v1074_v24, %v1075_v61  ;;  %v3914_v24 = vpop.f32.mrb[14].mxu1 }
 0x111   :  { %v1566_v27 = vmax.f32 %v1564_v52, %v1565_v10  ;;  %v696_v17 = vrot.slane %v695_v20, 2  ;;  %v3907_v22 = vsel %vm1043_vm5, %v664_v7, -inf  ;;  %v1793_v43 = vsel %vm1043_vm5, %v1547_v3, -inf }
 0x112   :  { %v702_v45 = vmax.f32 %v700_v23, %v701_v34  ;;  %v1375_v35 = vrot.slane %v3755_v36, %v3837_v5  ;;  %v1554_v46 = vmax.f32 %v1552_v15, %v1553_v55  ;;  %v1382_v61 = vrot.slane %v1368_v47, %v3837_v5  ;;  %v3924_v23 = vld [vmem:[%s4886_s4 + $0x1] ss:$0 sm:$0xff] }
 0x113   :  { %v1567_v60 = vrot.slane %v1566_v27, 1  ;;  %v697_v58 = vmax.f32 %v695_v20, %v696_v17  ;;  %v1561_v1 = vmax.f32 %v1559_v56, %v1560_v29  ;;  %v476_v15 = vcombine.high %v3788_v39, %v3788_v39  ;;  %v3191_v20 = vpop.f32.mrb[15].mxu1 }
 0x114   :  { %v703_v2 = vrot.slane %v702_v45, 2  ;;  %v1383_v16 = vcombine.high %v1375_v35, %v1375_v35  ;;  %v1569_v30 = vsel %vm1540_vm6, %v1375_v35, -inf  ;;  %v1384_v50 = vcombine.high %v1382_v61, %v1382_v61 }
 0x115   :  { %v1568_v59 = vmax.f32 %v1566_v27, %v1567_v60  ;;  %v698_v52 = vrot.slane %v697_v58, 1  ;;  %v1570_v7 = vrot.slane %v1569_v30, 4  ;;  %v1583_v36 = vsel %vm1540_vm6, %v1382_v61, -inf }
 0x116   :  { %v704_v3 = vmax.f32 %v702_v45, %v703_v2  ;;  %v1576_v10 = vsel %vm1540_vm6, %v1383_v16, -inf  ;;  %v1584_v47 = vrot.slane %v1583_v36, 4  ;;  %v1590_v45 = vsel %vm1540_vm6, %v1384_v50, -inf }
 0x117   :  { %v1794_v56 = vsel %vm1043_vm5, %v1568_v59, -inf  ;;  %v699_v55 = vmax.f32 %v697_v58, %v698_v52  ;;  %v1571_v29 = vmax.f32 %v1569_v30, %v1570_v7  ;;  %v1577_v34 = vrot.slane %v1576_v10, 4 }
 0x118   :  { %v1795_v27 = vmax.f32 %v1793_v43, %v1794_v56  ;;  %v705_v17 = vrot.slane %v704_v3, 1  ;;  %v1591_v2 = vrot.slane %v1590_v45, 4  ;;  %v1799_v16 = vsel %vm1043_vm5, %v1561_v1, -inf }
 0x119   :  { %v1077_v35 = vsel %vm1043_vm5, %v699_v55, -inf  ;;  %v1572_v60 = vrot.slane %v1571_v29, 2  ;;  %v1578_v61 = vmax.f32 %v1576_v10, %v1577_v34  ;;  %v1585_v58 = vmax.f32 %v1583_v36, %v1584_v47  ;;  %v3937_v34 = vpop.f32.mrb[28].mxu0 }
 0x11a   :  { %v3930_v59 = vadd.f32 %v3924_v23, %v1795_v27  ;;  %v1078_v20 = vmax.f32 %v3899_v37, %v1077_v35  ;;  %v1592_v43 = vmax.f32 %v1590_v45, %v1591_v2  ;;  %v679_v7 = vsel %vm538_vm4, %v3788_v39, -inf }
 0x11b   :  { %v1573_v30 = vmax.f32 %v1571_v29, %v1572_v60  ;;  %v1579_v52 = vrot.slane %v1578_v61, 2  ;;  %v706_v56 = vmax.f32 %v704_v3, %v705_v17  ;;  %v1586_v55 = vrot.slane %v1585_v58, 2 }
 0x11c   :  { %4917 = vst [vmem:[#allocation5_spill] sm:$0xff] %v3930_v59  ;;  %v1796_v10 = vsel %vm1043_vm5, %v1554_v46, -inf  ;;  %v1593_v8 = vrot.slane %v1592_v43, 2  ;;  %v680_v4 = vrot.slane %v679_v7, 4  ;;  %v686_v36 = vsel %vm538_vm4, %v476_v15, -inf }
 0x11d   :  { %v1574_v1 = vrot.slane %v1573_v30, 1  ;;  %v1580_v27 = vmax.f32 %v1578_v61, %v1579_v52  ;;  %v1587_v37 = vmax.f32 %v1585_v58, %v1586_v55  ;;  %v1081_v29 = vmax.f32 %v3847_v14, %v3907_v22  ;;  %v3948_v14 = vpop.f32.mrb[16].mxu1 }
 0x11e   :  { %v1385_v39 = vcombine.high %v3761_v57, %v3761_v57  ;;  %v1594_v17 = vmax.f32 %v1592_v43, %v1593_v8  ;;  %v681_v45 = vmax.f32 %v679_v7, %v680_v4  ;;  %v687_v35 = vrot.slane %v686_v36, 4  ;;  %v3194_v8 = vpop.f32.mrb[17].mxu1 }
 0x11f   :  { %v1575_v47 = vmax.f32 %v1573_v30, %v1574_v1  ;;  %v1581_v3 = vrot.slane %v1580_v27, 1  ;;  %v1588_v46 = vrot.slane %v1587_v37, 1  ;;  %v1392_v60 = vrot.slane %v3761_v57, %v3837_v5 }
 0x120   :  { %v1399_v61 = vrot.slane %v1385_v39, %v3837_v5  ;;  %v1595_v58 = vrot.slane %v1594_v17, 1  ;;  %v682_v52 = vrot.slane %v681_v45, 2  ;;  %v688_v30 = vmax.f32 %v686_v36, %v687_v35 }
 0x121   :  { %v1582_v2 = vmax.f32 %v1580_v27, %v1581_v3  ;;  %v1797_v15 = vsel %vm1043_vm5, %v1575_v47, -inf  ;;  %v1589_v22 = vmax.f32 %v1587_v37, %v1588_v46  ;;  %v1400_v1 = vcombine.high %v1392_v60, %v1392_v60 }
 0x122   :  { %v1798_v55 = vmax.f32 %v1796_v10, %v1797_v15  ;;  %v3951_v4 = vsel %vm1043_vm5, %v706_v56, -inf  ;;  %v683_v57 = vmax.f32 %v681_v45, %v682_v52  ;;  %v1401_v7 = vcombine.high %v1399_v61, %v1399_v61 }
 0x123   :  { %v1800_v43 = vsel %vm1043_vm5, %v1582_v2, -inf  ;;  %v3955_v27 = vadd.f32 %v3819_v32, %v1078_v20  ;;  %v689_v3 = vrot.slane %v688_v30, 2  ;;  %v1597_v10 = vsel %vm1540_vm6, %v1392_v60, -inf }
 0x124   :  { %v1801_v39 = vmax.f32 %v1799_v16, %v1800_v43  ;;  %v3958_v47 = vadd.f32 %v3924_v23, %v1798_v55  ;;  %v684_v37 = vrot.slane %v683_v57, 1  ;;  %v1604_v36 = vsel %vm1540_vm6, %v1400_v1, -inf }
 0x125   :  { %v1611_v56 = vsel %vm1540_vm6, %v1399_v61, -inf  ;;  %v1596_v46 = vmax.f32 %v1594_v17, %v1595_v58  ;;  %v3964_v35 = vsel %vm1043_vm5, %v1589_v22, -inf  ;;  %v690_v45 = vmax.f32 %v688_v30, %v689_v3  ;;  %v3972_v22 = vpop.f32.mrb[29].mxu0 }
 0x126   :  { %4918 = vst [vmem:[#allocation6_spill] sm:$0xff] %v3958_v47  ;;  %4919 = vst [vmem:[#allocation7_spill] sm:$0xff] %v3964_v35  ;;  %v1598_v2 = vrot.slane %v1597_v10, 4  ;;  %v685_v20 = vmax.f32 %v683_v57, %v684_v37  ;;  %v1605_v15 = vrot.slane %v1604_v36, 4  ;;  %v1612_v16 = vrot.slane %v1611_v56, 4 }
 0x127   :  { %v1618_v52 = vsel %vm1540_vm6, %v1401_v7, -inf  ;;  %v3968_v55 = vadd.f32 %v3924_v23, %v1801_v39  ;;  %v691_v8 = vrot.slane %v690_v45, 1  ;;  %v479_v23 = vcombine.high %v3799_v54, %v3799_v54 }
 0x128   :  { %v1599_v60 = vmax.f32 %v1597_v10, %v1598_v2  ;;  %v1619_v43 = vrot.slane %v1618_v52, 4  ;;  %v1082_v17 = vsel %vm1043_vm5, %v685_v20, -inf  ;;  %v1606_v61 = vmax.f32 %v1604_v36, %v1605_v15 }
 0x129   :  { %4920 = vst [vmem:[#allocation8_spill] sm:$0xff] %v3968_v55  ;;  %v1613_v58 = vmax.f32 %v1611_v56, %v1612_v16  ;;  %v692_v30 = vmax.f32 %v690_v45, %v691_v8  ;;  %v3974_v57 = vmax.f32 %v1081_v29, %v1082_v17  ;;  %v721_v39 = vsel %vm538_vm4, %v3799_v54, -inf }
 0x12a   :  { %v1600_v3 = vrot.slane %v1599_v60, 2  ;;  %v1620_v37 = vmax.f32 %v1618_v52, %v1619_v43  ;;  %v1607_v7 = vrot.slane %v1606_v61, 2  ;;  %v722_v15 = vrot.slane %v721_v39, 4 }
 0x12b   :  { %v1614_v50 = vrot.slane %v1613_v58, 2  ;;  %v1070_v10 = vsel %vm1043_vm5, %v692_v30, -inf  ;;  %v728_v8 = vsel %vm538_vm4, %v479_v23, -inf  ;;  %v1402_v43 = vcombine.high %v3773_v18, %v3773_v18 }
 0x12c   :  { %v1601_v56 = vmax.f32 %v1599_v60, %v1600_v3  ;;  %v1621_v2 = vrot.slane %v1620_v37, 2  ;;  %v1071_v29 = vmax.f32 %v3888_v42, %v1070_v10  ;;  %v1608_v45 = vmax.f32 %v1606_v61, %v1607_v7 }
 0x12d   :  { %v1615_v20 = vmax.f32 %v1613_v58, %v1614_v50  ;;  %v3988_v30 = vsel %vm1043_vm5, %v1596_v46, -inf  ;;  %v723_v1 = vmax.f32 %v721_v39, %v722_v15  ;;  %v729_v38 = vrot.slane %v728_v8, 4 }
 0x12e   :  { %v1602_v16 = vrot.slane %v1601_v56, 1  ;;  %v1622_v52 = vmax.f32 %v1620_v37, %v1621_v2  ;;  %v1609_v54 = vrot.slane %v1608_v45, 1  ;;  %4921 = vst [vmem:[#allocation9_spill] sm:$0xff] %v3988_v30  ;;  %v1409_v42 = vrot.slane %v3773_v18, %v3837_v5 }
 0x12f   :  { %v1616_v17 = vrot.slane %v1615_v20, 1  ;;  %v724_v58 = vrot.slane %v723_v1, 2  ;;  %v1416_v37 = vrot.slane %v1402_v43, %v3837_v5  ;;  %v730_v10 = vmax.f32 %v728_v8, %v729_v38 }
 0x130   :  { %v1603_v60 = vmax.f32 %v1601_v56, %v1602_v16  ;;  %v1623_v3 = vrot.slane %v1622_v52, 1  ;;  %v1610_v50 = vmax.f32 %v1608_v45, %v1609_v54  ;;  %v1417_v2 = vcombine.high %v1409_v42, %v1409_v42 }
 0x131   :  { %v1617_v61 = vmax.f32 %v1615_v20, %v1616_v17  ;;  %v725_v56 = vmax.f32 %v723_v1, %v724_v58  ;;  %v1418_v15 = vcombine.high %v1416_v37, %v1416_v37  ;;  %v731_v16 = vrot.slane %v730_v10, 2 }
 0x132   :  { %v1624_v23 = vmax.f32 %v1622_v52, %v1623_v3  ;;  %v3995_v46 = vsel %vm1043_vm5, %v1610_v50, -inf  ;;  %v4005_v20 = vsel %vm1043_vm5, %v1603_v60, -inf  ;;  %v1625_v8 = vsel %vm1540_vm6, %v1409_v42, -inf }
 0x133   :  { %4922 = vst [vmem:[#allocation10_spill] sm:$0xff] %v3995_v46  ;;  %v3998_v39 = vsel %vm1043_vm5, %v1617_v61, -inf  ;;  %4924 = vst [vmem:[#allocation12_spill] sm:$0xff] %v4005_v20  ;;  %v726_v52 = vrot.slane %v725_v56, 1  ;;  %v1632_v43 = vsel %vm1540_vm6, %v1417_v2, -inf  ;;  %v732_v1 = vmax.f32 %v730_v10, %v731_v16 }
 0x134   :  { %4923 = vst [vmem:[#allocation11_spill] sm:$0xff] %v3998_v39  ;;  %v4008_v38 = vsel %vm1043_vm5, %v1624_v23, -inf  ;;  %v1626_v54 = vrot.slane %v1625_v8, 4  ;;  %v1633_v17 = vrot.slane %v1632_v43, 4  ;;  %v1639_v3 = vsel %vm1540_vm6, %v1416_v37, -inf }
 0x135   :  { %4925 = vst [vmem:[#allocation13_spill] sm:$0xff] %v4008_v38  ;;  %v4014_v50 = vadd.f32 %v3819_v32, %v1071_v29  ;;  %v1640_v61 = vrot.slane %v1639_v3, 4  ;;  %v1646_v60 = vsel %vm1540_vm6, %v1418_v15, -inf  ;;  %v478_v58 = vcombine.high %v3801_v63, %v3801_v63 }
 0x136   :  { %v733_v23 = vrot.slane %v732_v1, 1  ;;  %v1627_v7 = vmax.f32 %v1625_v8, %v1626_v54  ;;  %v1634_v45 = vmax.f32 %v1632_v43, %v1633_v17  ;;  %v1647_v42 = vrot.slane %v1646_v60, 4 }
 0x137   :  { %v1641_v2 = vmax.f32 %v1639_v3, %v1640_v61  ;;  %v707_v37 = vsel %vm538_vm4, %v3801_v63, -inf  ;;  %v714_v32 = vsel %vm538_vm4, %v478_v58, -inf  ;;  %v727_v29 = vmax.f32 %v725_v56, %v726_v52 }
 0x138   :  { %v1628_v16 = vrot.slane %v1627_v7, 2  ;;  %v1635_v18 = vrot.slane %v1634_v45, 2  ;;  %v1648_v15 = vmax.f32 %v1646_v60, %v1647_v42  ;;  %v708_v36 = vrot.slane %v707_v37, 4 }
 0x139   :  { %v1642_v13 = vrot.slane %v1641_v2, 2  ;;  %v715_v55 = vrot.slane %v714_v32, 4  ;;  %v481_v8 = vcombine.high %v3811_v19, %v3811_v19  ;;  %v734_v43 = vmax.f32 %v732_v1, %v733_v23 }
 0x13a   :  { %v1629_v54 = vmax.f32 %v1627_v7, %v1628_v16  ;;  %v1636_v17 = vmax.f32 %v1634_v45, %v1635_v18  ;;  %v1649_v10 = vrot.slane %v1648_v15, 2  ;;  %v709_v61 = vmax.f32 %v707_v37, %v708_v36 }
 0x13b   :  { %v1643_v3 = vmax.f32 %v1641_v2, %v1642_v13  ;;  %v716_v47 = vmax.f32 %v714_v32, %v715_v55  ;;  %v749_v63 = vsel %vm538_vm4, %v3811_v19, -inf  ;;  %v756_v20 = vsel %vm538_vm4, %v481_v8, -inf  ;;  %v4043_v8 = vpop.f32.mrb[30].mxu0 }
 0x13c   :  { %v1630_v56 = vrot.slane %v1629_v54, 1  ;;  %v1637_v52 = vrot.slane %v1636_v17, 1  ;;  %v1650_v58 = vmax.f32 %v1648_v15, %v1649_v10  ;;  %v750_v60 = vrot.slane %v749_v63, 4 }
 0x13d   :  { %v1644_v42 = vrot.slane %v1643_v3, 1  ;;  %v710_v59 = vrot.slane %v709_v61, 2  ;;  %v717_v38 = vrot.slane %v716_v47, 2  ;;  %v4030_v1 = vsel %vm1043_vm5, %v727_v29, -inf }
 0x13e   :  { %v1651_v7 = vrot.slane %v1650_v58, 1  ;;  %v1087_v13 = vsel %vm1043_vm5, %v734_v43, -inf  ;;  %v751_v36 = vmax.f32 %v749_v63, %v750_v60  ;;  %v1631_v55 = vmax.f32 %v1629_v54, %v1630_v56 }
 0x13f   :  { %v711_v18 = vmax.f32 %v709_v61, %v710_v59  ;;  %v718_v45 = vmax.f32 %v716_v47, %v717_v38  ;;  %v757_v19 = vrot.slane %v756_v20, 4  ;;  %v4033_v23 = vmax.f32 %v1636_v17, %v1637_v52 }
 0x140   :  { %v4035_v10 = vmax.f32 %v1643_v3, %v1644_v42  ;;  %v752_v2 = vrot.slane %v751_v36, 2  ;;  %v480_v37 = vcombine.high %v3813_v26, %v3813_v26  ;;  %v4039_v32 = vmax.f32 %v1650_v58, %v1651_v7 }
 0x141   :  { %4926 = vst [vmem:[#allocation14_spill] sm:$0xff] %v4033_v23  ;;  %v712_v29 = vrot.slane %v711_v18, 1  ;;  %v758_v16 = vmax.f32 %v756_v20, %v757_v19  ;;  %v735_v15 = vsel %vm538_vm4, %v3813_v26, -inf  ;;  %v483_v43 = vcombine.high %v3822_v44, %v3822_v44 }
 0x142   :  { %4927 = vst [vmem:[#allocation15_spill] sm:$0xff] %v4035_v10  ;;  %v753_v59 = vmax.f32 %v751_v36, %v752_v2  ;;  %v736_v47 = vrot.slane %v735_v15, 4  ;;  %v742_v38 = vsel %vm538_vm4, %v480_v37, -inf  ;;  %v719_v17 = vrot.slane %v718_v45, 1 }
 0x143   :  { %v713_v54 = vmax.f32 %v711_v18, %v712_v29  ;;  %v759_v3 = vrot.slane %v758_v16, 2  ;;  %v743_v61 = vrot.slane %v742_v38, 4  ;;  %v777_v20 = vsel %vm538_vm4, %v3822_v44, -inf }
 0x144   :  { %v754_v63 = vrot.slane %v753_v59, 1  ;;  %v737_v56 = vmax.f32 %v735_v15, %v736_v47  ;;  %v784_v26 = vsel %vm538_vm4, %v483_v43, -inf  ;;  %v4052_v52 = vsel %vm1043_vm5, %v1631_v55, -inf }
 0x145   :  { %v1086_v58 = vsel %vm1043_vm5, %v713_v54, -inf  ;;  %v760_v60 = vmax.f32 %v758_v16, %v759_v3  ;;  %v744_v42 = vmax.f32 %v742_v38, %v743_v61  ;;  %v778_v19 = vrot.slane %v777_v20, 4 }
 0x146   :  { %v1088_v7 = vmax.f32 %v1086_v58, %v1087_v13  ;;  %v755_v36 = vmax.f32 %v753_v59, %v754_v63  ;;  %v738_v18 = vrot.slane %v737_v56, 2  ;;  %v720_v2 = vmax.f32 %v718_v45, %v719_v17 }
 0x147   :  { %v745_v37 = vrot.slane %v744_v42, 2  ;;  %v785_v29 = vrot.slane %v784_v26, 4  ;;  %v482_v15 = vcombine.high %v3825_v48, %v3825_v48  ;;  %v779_v43 = vmax.f32 %v777_v20, %v778_v19 }
 0x148   :  { %v1089_v44 = vsel %vm1043_vm5, %v755_v36, -inf  ;;  %v739_v47 = vmax.f32 %v737_v56, %v738_v18  ;;  %v763_v55 = vsel %vm538_vm4, %v3825_v48, -inf  ;;  %v761_v54 = vrot.slane %v760_v60, 1 }
 0x149   :  { %v4060_v16 = vmax.f32 %v1088_v7, %v1089_v44  ;;  %v746_v13 = vmax.f32 %v744_v42, %v745_v37  ;;  %v786_v59 = vmax.f32 %v784_v26, %v785_v29  ;;  %v780_v3 = vrot.slane %v779_v43, 2  ;;  %v4067_v7 = vpop.f32.mrb[31].mxu0 }
 0x14a   :  { %v740_v38 = vrot.slane %v739_v47, 1  ;;  %v764_v45 = vrot.slane %v763_v55, 4  ;;  %v770_v17 = vsel %vm538_vm4, %v482_v15, -inf  ;;  %v1419_v56 = vcombine.high %v3790_v40, %v3790_v40 }
 0x14b   :  { %v747_v61 = vrot.slane %v746_v13, 1  ;;  %v787_v63 = vrot.slane %v786_v59, 2  ;;  %v771_v58 = vrot.slane %v770_v17, 4  ;;  %v781_v36 = vmax.f32 %v779_v43, %v780_v3 }
 0x14c   :  { %v741_v20 = vmax.f32 %v739_v47, %v740_v38  ;;  %v765_v18 = vmax.f32 %v763_v55, %v764_v45  ;;  %v1426_v48 = vrot.slane %v3790_v40, %v3837_v5  ;;  %v1433_v37 = vrot.slane %v1419_v56, %v3837_v5 }
 0x14d   :  { %v748_v26 = vmax.f32 %v746_v13, %v747_v61  ;;  %v788_v42 = vmax.f32 %v786_v59, %v787_v63  ;;  %v772_v19 = vmax.f32 %v770_v17, %v771_v58  ;;  %v4071_v29 = vsel %vm1043_vm5, %v720_v2, -inf  ;;  %v4081_v59 = vpop.f32.mrb[32].mxu0 }
 0x14e   :  { %v4074_v15 = vsel %vm1043_vm5, %v741_v20, -inf  ;;  %v766_v44 = vrot.slane %v765_v18, 2  ;;  %v1434_v47 = vcombine.high %v1426_v48, %v1426_v48  ;;  %v4076_v43 = vmax.f32 %v760_v60, %v761_v54  ;;  %4928 = vst [vmem:[#allocation16_spill] sm:$0xff] %v4081_v59 }
 0x14f   :  { %v1101_v55 = vsel %vm1043_vm5, %v748_v26, -inf  ;;  %v773_v13 = vrot.slane %v772_v19, 2  ;;  %v782_v38 = vrot.slane %v781_v36, 1  ;;  %v1435_v45 = vcombine.high %v1433_v37, %v1433_v37 }
 0x150   :  { %v767_v3 = vmax.f32 %v765_v18, %v766_v44  ;;  %v1102_v2 = vmax.f32 %v4030_v1, %v1101_v55  ;;  %v789_v17 = vrot.slane %v788_v42, 1  ;;  %v1653_v63 = vsel %vm1540_vm6, %v1426_v48, -inf }
 0x151   :  { %v774_v61 = vmax.f32 %v772_v19, %v773_v13  ;;  %v1660_v60 = vsel %vm1540_vm6, %v1434_v47, -inf  ;;  %v1654_v58 = vrot.slane %v1653_v63, 4  ;;  %v1667_v20 = vsel %vm1540_vm6, %v1433_v37, -inf }
 0x152   :  { %v768_v54 = vrot.slane %v767_v3, 1  ;;  %v1661_v56 = vrot.slane %v1660_v60, 4  ;;  %v1668_v40 = vrot.slane %v1667_v20, 4  ;;  %v1674_v10 = vsel %vm1540_vm6, %v1435_v45, -inf }
 0x153   :  { %v775_v26 = vrot.slane %v774_v61, 1  ;;  %v485_v18 = vcombine.high %v3839_v6, %v3839_v6  ;;  %v1655_v44 = vmax.f32 %v1653_v63, %v1654_v58  ;;  %v1675_v19 = vrot.slane %v1674_v10, 4 }
 0x154   :  { %v769_v1 = vmax.f32 %v767_v3, %v768_v54  ;;  %v1662_v55 = vmax.f32 %v1660_v60, %v1661_v56  ;;  %v4090_v13 = vmax.f32 %v781_v36, %v782_v38  ;;  %v1669_v48 = vmax.f32 %v1667_v20, %v1668_v40 }
 0x155   :  { %v805_v47 = vsel %vm538_vm4, %v3839_v6, -inf  ;;  %v812_v23 = vsel %vm538_vm4, %v485_v18, -inf  ;;  %v1656_v59 = vrot.slane %v1655_v44, 2  ;;  %v1676_v45 = vmax.f32 %v1674_v10, %v1675_v19 }
 0x156   :  { %v1103_v37 = vsel %vm1043_vm5, %v769_v1, -inf  ;;  %v1663_v39 = vrot.slane %v1662_v55, 2  ;;  %v776_v30 = vmax.f32 %v774_v61, %v775_v26  ;;  %v1670_v3 = vrot.slane %v1669_v48, 2 }
 0x157   :  { %v4096_v46 = vmax.f32 %v1102_v2, %v1103_v37  ;;  %v806_v63 = vrot.slane %v805_v47, 4  ;;  %v1657_v60 = vmax.f32 %v1655_v44, %v1656_v59  ;;  %v1677_v36 = vrot.slane %v1676_v45, 2  ;;  %v4102_v2 = vpop.f32.mrb[33].mxu0 }
 0x158   :  { %v1664_v54 = vmax.f32 %v1662_v55, %v1663_v39  ;;  %v813_v38 = vrot.slane %v812_v23, 4  ;;  %v1671_v40 = vmax.f32 %v1669_v48, %v1670_v3  ;;  %v484_v6 = vcombine.high %v3843_v12, %v3843_v12  ;;  %4929 = vst [vmem:[#allocation17_spill] sm:$0xff] %v4102_v2 }
 0x159   :  { %v807_v58 = vmax.f32 %v805_v47, %v806_v63  ;;  %v791_v56 = vsel %vm538_vm4, %v3843_v12, -inf  ;;  %v1658_v20 = vrot.slane %v1657_v60, 1  ;;  %v1678_v10 = vmax.f32 %v1676_v45, %v1677_v36 }
 0x15a   :  { %v1665_v18 = vrot.slane %v1664_v54, 1  ;;  %v814_v61 = vmax.f32 %v812_v23, %v813_v38  ;;  %v1672_v26 = vrot.slane %v1671_v40, 1  ;;  %v792_v59 = vrot.slane %v791_v56, 4  ;;  %v4112_v23 = vpop.f32.mrb[34].mxu0 }
 0x15b   :  { %v808_v1 = vrot.slane %v807_v58, 2  ;;  %v798_v39 = vsel %vm538_vm4, %v484_v6, -inf  ;;  %v4105_v44 = vmax.f32 %v788_v42, %v789_v17  ;;  %v4108_v55 = vsel %vm1043_vm5, %v776_v30, -inf  ;;  %4930 = vst [vmem:[#allocation18_spill] sm:$0xff] %v4112_v23 }
 0x15c   :  { %v1679_v19 = vrot.slane %v1678_v10, 1  ;;  %v815_v48 = vrot.slane %v814_v61, 2  ;;  %v4110_v47 = vmax.f32 %v1657_v60, %v1658_v20  ;;  %v793_v37 = vmax.f32 %v791_v56, %v792_v59 }
 0x15d   :  { %v809_v12 = vmax.f32 %v807_v58, %v808_v1  ;;  %v799_v45 = vrot.slane %v798_v39, 4  ;;  %v4114_v3 = vmax.f32 %v1664_v54, %v1665_v18  ;;  %v4116_v63 = vmax.f32 %v1671_v40, %v1672_v26  ;;  %v4127_v40 = vpop.f32.mrb[35].mxu0 }
 0x15e   :  { %v816_v36 = vmax.f32 %v814_v61, %v815_v48  ;;  %v487_v42 = vcombine.high %v3856_v25, %v3856_v25  ;;  %v4120_v17 = vmax.f32 %v1678_v10, %v1679_v19  ;;  %v794_v38 = vrot.slane %v793_v37, 2  ;;  %4932 = vst [vmem:[#allocation20_spill] sm:$0xff] %v4127_v40 }
 0x15f   :  { %4931 = vst [vmem:[#allocation19_spill] sm:$0xff] %v4114_v3  ;;  %v810_v30 = vrot.slane %v809_v12, 1  ;;  %v800_v6 = vmax.f32 %v798_v39, %v799_v45  ;;  %v833_v58 = vsel %vm538_vm4, %v3856_v25, -inf  ;;  %v486_v54 = vcombine.high %v3862_v31, %v3862_v31 }
 0x160   :  { %v817_v60 = vrot.slane %v816_v36, 1  ;;  %v840_v56 = vsel %vm538_vm4, %v487_v42, -inf  ;;  %v795_v18 = vmax.f32 %v793_v37, %v794_v38  ;;  %v834_v26 = vrot.slane %v833_v58, 4 }
 0x161   :  { %v811_v20 = vmax.f32 %v809_v12, %v810_v30  ;;  %v801_v61 = vrot.slane %v800_v6, 2  ;;  %v841_v1 = vrot.slane %v840_v56, 4  ;;  %v819_v59 = vsel %vm538_vm4, %v3862_v31, -inf }
 0x162   :  { %v818_v10 = vmax.f32 %v816_v36, %v817_v60  ;;  %v826_v39 = vsel %vm538_vm4, %v486_v54, -inf  ;;  %v796_v19 = vrot.slane %v795_v18, 1  ;;  %v835_v45 = vmax.f32 %v833_v58, %v834_v26 }
 0x163   :  { %v4133_v25 = vsel %vm1043_vm5, %v811_v20, -inf  ;;  %v802_v48 = vmax.f32 %v800_v6, %v801_v61  ;;  %v842_v3 = vmax.f32 %v840_v56, %v841_v1  ;;  %v820_v12 = vrot.slane %v819_v59, 4 }
 0x164   :  { %v1108_v42 = vsel %vm1043_vm5, %v818_v10, -inf  ;;  %v827_v37 = vrot.slane %v826_v39, 4  ;;  %v797_v30 = vmax.f32 %v795_v18, %v796_v19  ;;  %v836_v36 = vrot.slane %v835_v45, 2 }
 0x165   :  { %v803_v38 = vrot.slane %v802_v48, 1  ;;  %v489_v60 = vcombine.high %v3872_v53, %v3872_v53  ;;  %v843_v31 = vrot.slane %v842_v3, 2  ;;  %v821_v40 = vmax.f32 %v819_v59, %v820_v12 }
 0x166   :  { %v828_v54 = vmax.f32 %v826_v39, %v827_v37  ;;  %v861_v20 = vsel %vm538_vm4, %v3872_v53, -inf  ;;  %v1107_v6 = vsel %vm1043_vm5, %v797_v30, -inf  ;;  %v837_v58 = vmax.f32 %v835_v45, %v836_v36 }
 0x167   :  { %v804_v23 = vmax.f32 %v802_v48, %v803_v38  ;;  %v862_v61 = vrot.slane %v861_v20, 4  ;;  %v1109_v56 = vmax.f32 %v1107_v6, %v1108_v42  ;;  %v844_v26 = vmax.f32 %v842_v3, %v843_v31 }
 0x168   :  { %v822_v10 = vrot.slane %v821_v40, 2  ;;  %v829_v18 = vrot.slane %v828_v54, 2  ;;  %v838_v1 = vrot.slane %v837_v58, 1  ;;  %v868_v35 = vsel %vm538_vm4, %v489_v60, -inf }
 0x169   :  { %v1114_v19 = vsel %vm1043_vm5, %v804_v23, -inf  ;;  %v863_v2 = vmax.f32 %v861_v20, %v862_v61  ;;  %v845_v59 = vrot.slane %v844_v26, 1  ;;  %v869_v37 = vrot.slane %v868_v35, 4 }
 0x16a   :  { %v823_v39 = vmax.f32 %v821_v40, %v822_v10  ;;  %v830_v12 = vmax.f32 %v828_v54, %v829_v18  ;;  %v839_v53 = vmax.f32 %v837_v58, %v838_v1  ;;  %v488_v45 = vcombine.high %v3876_v62, %v3876_v62 }
 0x16b   :  { %v864_v48 = vrot.slane %v863_v2, 2  ;;  %v847_v3 = vsel %vm538_vm4, %v3876_v62, -inf  ;;  %v846_v42 = vmax.f32 %v844_v26, %v845_v59  ;;  %v870_v36 = vmax.f32 %v868_v35, %v869_v37 }
 0x16c   :  { %v824_v30 = vrot.slane %v823_v39, 1  ;;  %v831_v38 = vrot.slane %v830_v12, 1  ;;  %v1110_v23 = vsel %vm1043_vm5, %v839_v53, -inf  ;;  %v848_v60 = vrot.slane %v847_v3, 4 }
 0x16d   :  { %v865_v31 = vmax.f32 %v863_v2, %v864_v48  ;;  %v854_v40 = vsel %vm538_vm4, %v488_v45, -inf  ;;  %v4149_v54 = vmax.f32 %v1109_v56, %v1110_v23  ;;  %v1117_v20 = vsel %vm1043_vm5, %v846_v42, -inf }
 0x16e   :  { %v825_v6 = vmax.f32 %v823_v39, %v824_v30  ;;  %v832_v58 = vmax.f32 %v830_v12, %v831_v38  ;;  %v871_v10 = vrot.slane %v870_v36, 2  ;;  %v849_v18 = vmax.f32 %v847_v3, %v848_v60 }
 0x16f   :  { %v866_v61 = vrot.slane %v865_v31, 1  ;;  %v855_v62 = vrot.slane %v854_v40, 4  ;;  %v491_v2 = vcombine.high %v3882_v11, %v3882_v11  ;;  %v889_v1 = vsel %vm538_vm4, %v3882_v11, -inf }
 0x170   :  { %v1115_v26 = vsel %vm1043_vm5, %v825_v6, -inf  ;;  %v1122_v35 = vsel %vm1043_vm5, %v832_v58, -inf  ;;  %v872_v37 = vmax.f32 %v870_v36, %v871_v10  ;;  %v850_v53 = vrot.slane %v849_v18, 2 }
 0x171   :  { %v1116_v56 = vmax.f32 %v1114_v19, %v1115_v26  ;;  %v867_v59 = vmax.f32 %v865_v31, %v866_v61  ;;  %v856_v39 = vmax.f32 %v854_v40, %v855_v62  ;;  %v1123_v12 = vmax.f32 %v4133_v25, %v1122_v35 }
 0x172   :  { %v890_v48 = vrot.slane %v889_v1, 4  ;;  %v896_v45 = vsel %vm538_vm4, %v491_v2, -inf  ;;  %v873_v3 = vrot.slane %v872_v37, 1  ;;  %v851_v38 = vmax.f32 %v849_v18, %v850_v53 }
 0x173   :  { %v1118_v42 = vmax.f32 %v1116_v56, %v1117_v20  ;;  %v1119_v30 = vsel %vm1043_vm5, %v867_v59, -inf  ;;  %v857_v23 = vrot.slane %v856_v39, 2  ;;  %v897_v6 = vrot.slane %v896_v45, 4 }
 0x174   :  { %v891_v60 = vmax.f32 %v889_v1, %v890_v48  ;;  %v1436_v11 = vcombine.high %v3808_v9, %v3808_v9  ;;  %v874_v19 = vmax.f32 %v872_v37, %v873_v3  ;;  %v852_v31 = vrot.slane %v851_v38, 1 }
 0x175   :  { %v1120_v36 = vmax.f32 %v1118_v42, %v1119_v30  ;;  %v1443_v25 = vrot.slane %v3808_v9, %v3837_v5  ;;  %v858_v40 = vmax.f32 %v856_v39, %v857_v23  ;;  %v898_v61 = vmax.f32 %v896_v45, %v897_v6  ;;  %v4174_v9 = vld [vmem:[%s4886_s4] ss:$0 sm:$0xff] }
 0x176   :  { %v892_v58 = vrot.slane %v891_v60, 2  ;;  %v1450_v20 = vrot.slane %v1436_v11, %v3837_v5  ;;  %v4168_v10 = vsel %vm1043_vm5, %v4110_v47, -inf  ;;  %v1126_v18 = vsel %vm1043_vm5, %v874_v19, -inf }
 0x177   :  { %v853_v62 = vmax.f32 %v851_v38, %v852_v31  ;;  %v1451_v26 = vcombine.high %v1443_v25, %v1443_v25  ;;  %v859_v35 = vrot.slane %v858_v40, 1  ;;  %v899_v1 = vrot.slane %v898_v61, 2 }
 0x178   :  { %v893_v2 = vmax.f32 %v891_v60, %v892_v58  ;;  %v1452_v56 = vcombine.high %v1450_v20, %v1450_v20  ;;  %v4177_v59 = vadd.f32 %v4174_v9, %v1120_v36  ;;  %v1681_v47 = vsel %vm1540_vm6, %v1443_v25, -inf }
 0x179   :  { %v1124_v37 = vsel %vm1043_vm5, %v853_v62, -inf  ;;  %v1688_v53 = vsel %vm1540_vm6, %v1451_v26, -inf  ;;  %v860_v39 = vmax.f32 %v858_v40, %v859_v35  ;;  %v900_v3 = vmax.f32 %v898_v61, %v899_v1 }
 0x17a   :  { %v1125_v48 = vmax.f32 %v1123_v12, %v1124_v37  ;;  %v894_v45 = vrot.slane %v893_v2, 1  ;;  %v1682_v42 = vrot.slane %v1681_v47, 4  ;;  %v1689_v30 = vrot.slane %v1688_v53, 4 }
 0x17b   :  { %v1695_v38 = vsel %vm1540_vm6, %v1450_v20, -inf  ;;  %v1702_v23 = vsel %vm1540_vm6, %v1452_v56, -inf  ;;  %v1112_v60 = vsel %vm1043_vm5, %v860_v39, -inf  ;;  %v901_v19 = vrot.slane %v900_v3, 1 }
 0x17c   :  { %v1127_v6 = vmax.f32 %v1125_v48, %v1126_v18  ;;  %v895_v11 = vmax.f32 %v893_v2, %v894_v45  ;;  %v1113_v36 = vmax.f32 %v4149_v54, %v1112_v60  ;;  %v1683_v31 = vmax.f32 %v1681_v47, %v1682_v42 }
 0x17d   :  { %v1690_v25 = vmax.f32 %v1688_v53, %v1689_v30  ;;  %v1696_v58 = vrot.slane %v1695_v38, 4  ;;  %v4188_v12 = vsel %vm1043_vm5, %v4116_v63, -inf  ;;  %v1703_v20 = vrot.slane %v1702_v23, 4 }
 0x17e   :  { %4933 = vst [vmem:[#allocation21_spill] sm:$0xff] %v4188_v12  ;;  %v4192_v61 = vadd.f32 %v4174_v9, %v1127_v6  ;;  %v902_v62 = vmax.f32 %v900_v3, %v901_v19  ;;  %v1684_v26 = vrot.slane %v1683_v31, 2  ;;  %v4195_v2 = vadd.f32 %v4174_v9, %v1113_v36 }
 0x17f   :  { %v1691_v18 = vrot.slane %v1690_v25, 2  ;;  %v1697_v35 = vmax.f32 %v1695_v38, %v1696_v58  ;;  %v4198_v54 = vsel %vm1043_vm5, %v895_v11, -inf  ;;  %v1704_v1 = vmax.f32 %v1702_v23, %v1703_v20 }
 0x180   :  { %v490_v63 = vcombine.high %v3885_v28, %v3885_v28  ;;  %v1685_v37 = vmax.f32 %v1683_v31, %v1684_v26  ;;  %v4205_v48 = vsel %vm1043_vm5, %v4120_v17, -inf  ;;  %v875_v45 = vsel %vm538_vm4, %v3885_v28, -inf }
 0x181   :  { %v1692_v47 = vmax.f32 %v1690_v25, %v1691_v18  ;;  %v1698_v53 = vrot.slane %v1697_v35, 2  ;;  %v1705_v39 = vrot.slane %v1704_v1, 2  ;;  %4934 = vst [vmem:[#allocation22_spill] sm:$0xff] %v4205_v48  ;;  %v876_v23 = vrot.slane %v875_v45, 4 }
 0x182   :  { %v882_v3 = vsel %vm538_vm4, %v490_v63, -inf  ;;  %v1686_v42 = vrot.slane %v1685_v37, 1  ;;  %v1453_v11 = vcombine.high %v3878_v0, %v3878_v0  ;;  %v1460_v19 = vrot.slane %v3878_v0, %v3837_v5 }
 0x183   :  { %v1693_v30 = vrot.slane %v1692_v47, 1  ;;  %v1699_v38 = vmax.f32 %v1697_v35, %v1698_v53  ;;  %v1706_v60 = vmax.f32 %v1704_v1, %v1705_v39  ;;  %v883_v6 = vrot.slane %v882_v3, 4 }
 0x184   :  { %v877_v25 = vmax.f32 %v875_v45, %v876_v23  ;;  %v1467_v20 = vrot.slane %v1453_v11, %v3837_v5  ;;  %v1468_v26 = vcombine.high %v1460_v19, %v1460_v19  ;;  %v1687_v18 = vmax.f32 %v1685_v37, %v1686_v42 }
 0x185   :  { %v1694_v36 = vmax.f32 %v1692_v47, %v1693_v30  ;;  %v1700_v31 = vrot.slane %v1699_v38, 1  ;;  %v1707_v28 = vrot.slane %v1706_v60, 1  ;;  %v884_v58 = vmax.f32 %v882_v3, %v883_v6 }
 0x186   :  { %v878_v63 = vrot.slane %v877_v25, 2  ;;  %v1469_v56 = vcombine.high %v1467_v20, %v1467_v20  ;;  %v1709_v3 = vsel %vm1540_vm6, %v1460_v19, -inf  ;;  %v1716_v30 = vsel %vm1540_vm6, %v1468_v26, -inf }
 0x187   :  { %v1701_v35 = vmax.f32 %v1699_v38, %v1700_v31  ;;  %v4217_v1 = vsel %vm1043_vm5, %v1694_v36, -inf  ;;  %v1708_v53 = vmax.f32 %v1706_v60, %v1707_v28  ;;  %v885_v39 = vrot.slane %v884_v58, 2 }
 0x188   :  { %4935 = vst [vmem:[#allocation23_spill] sm:$0xff] %v4217_v1  ;;  %v879_v45 = vmax.f32 %v877_v25, %v878_v63  ;;  %v4229_v38 = vsel %vm1043_vm5, %v902_v62, -inf  ;;  %v1710_v23 = vrot.slane %v1709_v3, 4  ;;  %v4232_v60 = vsel %vm1043_vm5, %v1687_v18, -inf }
 0x189   :  { %v4222_v47 = vsel %vm1043_vm5, %v1701_v35, -inf  ;;  %v886_v42 = vmax.f32 %v884_v58, %v885_v39  ;;  %4937 = vst [vmem:[#allocation25_spill] sm:$0xff] %v4232_v60  ;;  %v1717_v11 = vrot.slane %v1716_v30, 4  ;;  %v1723_v36 = vsel %vm1540_vm6, %v1467_v20, -inf }
 0x18a   :  { %4936 = vst [vmem:[#allocation24_spill] sm:$0xff] %v4222_v47  ;;  %v880_v6 = vrot.slane %v879_v45, 1  ;;  %v4236_v31 = vsel %vm1043_vm5, %v1708_v53, -inf  ;;  %v1711_v19 = vmax.f32 %v1709_v3, %v1710_v23  ;;  %v1724_v25 = vrot.slane %v1723_v36, 4 }
 0x18b   :  { %4938 = vst [vmem:[#allocation26_spill] sm:$0xff] %v4236_v31  ;;  %v1730_v28 = vsel %vm1540_vm6, %v1469_v56, -inf  ;;  %v1718_v58 = vmax.f32 %v1716_v30, %v1717_v11  ;;  %v493_v62 = vcombine.high %v3892_v51, %v3892_v51  ;;  %v887_v63 = vrot.slane %v886_v42, 1 }
 0x18c   :  { %v881_v26 = vmax.f32 %v879_v45, %v880_v6  ;;  %v1731_v35 = vrot.slane %v1730_v28, 4  ;;  %v1712_v18 = vrot.slane %v1711_v19, 2  ;;  %v1725_v39 = vmax.f32 %v1723_v36, %v1724_v25 }
 0x18d   :  { %v917_v37 = vsel %vm538_vm4, %v3892_v51, -inf  ;;  %v1719_v53 = vrot.slane %v1718_v58, 2  ;;  %v924_v30 = vsel %vm538_vm4, %v493_v62, -inf  ;;  %v492_v51 = vcombine.high %v3901_v33, %v3901_v33 }
 0x18e   :  { %v1128_v20 = vsel %vm1043_vm5, %v881_v26, -inf  ;;  %v1732_v0 = vmax.f32 %v1730_v28, %v1731_v35  ;;  %v918_v3 = vrot.slane %v917_v37, 4  ;;  %v1713_v56 = vmax.f32 %v1711_v19, %v1712_v18 }
 0x18f   :  { %v1130_v23 = vmax.f32 %v1128_v20, %v4229_v38  ;;  %v1726_v45 = vrot.slane %v1725_v39, 2  ;;  %v1720_v6 = vmax.f32 %v1718_v58, %v1719_v53  ;;  %v925_v17 = vrot.slane %v924_v30, 4 }
 0x190   :  { %v1733_v11 = vrot.slane %v1732_v0, 2  ;;  %v919_v40 = vmax.f32 %v917_v37, %v918_v3  ;;  %v1714_v47 = vrot.slane %v1713_v56, 1  ;;  %v903_v25 = vsel %vm538_vm4, %v3901_v33, -inf }
 0x191   :  { %v1727_v36 = vmax.f32 %v1725_v39, %v1726_v45  ;;  %v1721_v28 = vrot.slane %v1720_v6, 1  ;;  %v926_v38 = vmax.f32 %v924_v30, %v925_v17  ;;  %v904_v20 = vrot.slane %v903_v25, 4 }
 0x192   :  { %v1734_v26 = vmax.f32 %v1732_v0, %v1733_v11  ;;  %v920_v35 = vrot.slane %v919_v40, 2  ;;  %v1715_v19 = vmax.f32 %v1713_v56, %v1714_v47  ;;  %v910_v58 = vsel %vm538_vm4, %v492_v51, -inf }
 0x193   :  { %v1728_v18 = vrot.slane %v1727_v36, 1  ;;  %v888_v62 = vmax.f32 %v886_v42, %v887_v63  ;;  %v927_v3 = vrot.slane %v926_v38, 2  ;;  %v905_v48 = vmax.f32 %v903_v25, %v904_v20 }
 0x194   :  { %v1735_v37 = vrot.slane %v1734_v26, 1  ;;  %v921_v53 = vmax.f32 %v919_v40, %v920_v35  ;;  %v911_v1 = vrot.slane %v910_v58, 4  ;;  %v4253_v33 = vmax.f32 %v1720_v6, %v1721_v28 }
 0x195   :  { %v1729_v45 = vmax.f32 %v1727_v36, %v1728_v18  ;;  %v4256_v0 = vsel %vm1043_vm5, %v1715_v19, -inf  ;;  %v928_v47 = vmax.f32 %v926_v38, %v927_v3  ;;  %v906_v30 = vrot.slane %v905_v48, 2 }
 0x196   :  { %v922_v17 = vrot.slane %v921_v53, 1  ;;  %v1736_v56 = vmax.f32 %v1734_v26, %v1735_v37  ;;  %v912_v11 = vmax.f32 %v910_v58, %v911_v1  ;;  %v1470_v40 = vcombine.high %v3914_v24, %v3914_v24 }
 0x197   :  { %v929_v63 = vrot.slane %v928_v47, 1  ;;  %v1135_v51 = vsel %vm1043_vm5, %v888_v62, -inf  ;;  %v1477_v36 = vrot.slane %v3914_v24, %v3837_v5  ;;  %v4264_v6 = vsel %vm1043_vm5, %v1729_v45, -inf }
 0x198   :  { %v923_v42 = vmax.f32 %v921_v53, %v922_v17  ;;  %v907_v25 = vmax.f32 %v905_v48, %v906_v30  ;;  %v913_v28 = vrot.slane %v912_v11, 2  ;;  %v1484_v35 = vrot.slane %v1470_v40, %v3837_v5 }
 0x199   :  { %v930_v26 = vmax.f32 %v928_v47, %v929_v63  ;;  %v1485_v38 = vcombine.high %v1477_v36, %v1477_v36  ;;  %v1737_v19 = vsel %vm1540_vm6, %v1477_v36, -inf  ;;  %v4272_v24 = vsel %vm1043_vm5, %v1736_v56, -inf }
 0x19a   :  { %v1131_v1 = vsel %vm1043_vm5, %v923_v42, -inf  ;;  %v908_v20 = vrot.slane %v907_v25, 1  ;;  %v914_v58 = vmax.f32 %v912_v11, %v913_v28  ;;  %v1486_v62 = vcombine.high %v1484_v35, %v1484_v35 }
 0x19b   :  { %v4269_v18 = vmax.f32 %v1130_v23, %v1131_v1  ;;  %v1738_v37 = vrot.slane %v1737_v19, 4  ;;  %v1744_v48 = vsel %vm1540_vm6, %v1485_v38, -inf  ;;  %v1751_v53 = vsel %vm1540_vm6, %v1484_v35, -inf }
 0x19c   :  { %v909_v3 = vmax.f32 %v907_v25, %v908_v20  ;;  %v915_v45 = vrot.slane %v914_v58, 1  ;;  %v1745_v17 = vrot.slane %v1744_v48, 4  ;;  %v1752_v47 = vrot.slane %v1751_v53, 4 }
 0x19d   :  { %v1739_v30 = vmax.f32 %v1737_v19, %v1738_v37  ;;  %v1758_v40 = vsel %vm1540_vm6, %v1486_v62, -inf  ;;  %v495_v23 = vcombine.high %v3937_v34, %v3937_v34  ;;  %v945_v11 = vsel %vm538_vm4, %v3937_v34, -inf }
 0x19e   :  { %v1138_v56 = vsel %vm1043_vm5, %v930_v26, -inf  ;;  %v1136_v42 = vsel %vm1043_vm5, %v909_v3, -inf  ;;  %v1746_v63 = vmax.f32 %v1744_v48, %v1745_v17  ;;  %v1753_v36 = vmax.f32 %v1751_v53, %v1752_v47 }
 0x19f   :  { %v1137_v28 = vmax.f32 %v1135_v51, %v1136_v42  ;;  %v1740_v25 = vrot.slane %v1739_v30, 2  ;;  %v1759_v35 = vrot.slane %v1758_v40, 4  ;;  %v946_v1 = vrot.slane %v945_v11, 4 }
 0x1a0   :  { %v916_v38 = vmax.f32 %v914_v58, %v915_v45  ;;  %v1747_v19 = vrot.slane %v1746_v63, 2  ;;  %v1754_v20 = vrot.slane %v1753_v36, 2  ;;  %v952_v62 = vsel %vm538_vm4, %v495_v23, -inf }
 0x1a1   :  { %v1741_v37 = vmax.f32 %v1739_v30, %v1740_v25  ;;  %v1760_v39 = vmax.f32 %v1758_v40, %v1759_v35  ;;  %v947_v31 = vmax.f32 %v945_v11, %v946_v1  ;;  %v953_v60 = vrot.slane %v952_v62, 4 }
 0x1a2   :  { %v1748_v34 = vmax.f32 %v1746_v63, %v1747_v19  ;;  %v1755_v12 = vmax.f32 %v1753_v36, %v1754_v20  ;;  %v4284_v26 = vmax.f32 %v1137_v28, %v1138_v56  ;;  %v1487_v48 = vcombine.high %v3948_v14, %v3948_v14 }
 0x1a3   :  { %v1742_v51 = vrot.slane %v1741_v37, 1  ;;  %v1761_v53 = vrot.slane %v1760_v39, 2  ;;  %v948_v3 = vrot.slane %v947_v31, 2  ;;  %v954_v17 = vmax.f32 %v952_v62, %v953_v60 }
 0x1a4   :  { %v1749_v58 = vrot.slane %v1748_v34, 1  ;;  %v1756_v45 = vrot.slane %v1755_v12, 1  ;;  %v1494_v47 = vrot.slane %v3948_v14, %v3837_v5  ;;  %v1501_v30 = vrot.slane %v1487_v48, %v3837_v5 }
 0x1a5   :  { %v1743_v40 = vmax.f32 %v1741_v37, %v1742_v51  ;;  %v1762_v23 = vmax.f32 %v1760_v39, %v1761_v53  ;;  %v949_v11 = vmax.f32 %v947_v31, %v948_v3  ;;  %v955_v42 = vrot.slane %v954_v17, 2 }
 0x1a6   :  { %v1750_v63 = vmax.f32 %v1748_v34, %v1749_v58  ;;  %v1502_v36 = vcombine.high %v1494_v47, %v1494_v47  ;;  %v1503_v28 = vcombine.high %v1501_v30, %v1501_v30  ;;  %v4294_v25 = vsel %vm1043_vm5, %v916_v38, -inf }
 0x1a7   :  { %v1757_v60 = vmax.f32 %v1755_v12, %v1756_v45  ;;  %v950_v35 = vrot.slane %v949_v11, 1  ;;  %v956_v1 = vmax.f32 %v954_v17, %v955_v42  ;;  %v1763_v19 = vrot.slane %v1762_v23, 1 }
 0x1a8   :  { %v4297_v14 = vsel %vm1043_vm5, %v1743_v40, -inf  ;;  %v1765_v5 = vsel %vm1540_vm6, %v1494_v47, -inf  ;;  %v1772_v31 = vsel %vm1540_vm6, %v1502_v36, -inf  ;;  %v4302_v39 = vsel %vm1043_vm5, %v1750_v63, -inf }
 0x1a9   :  { %v951_v20 = vmax.f32 %v949_v11, %v950_v35  ;;  %v957_v62 = vrot.slane %v956_v1, 1  ;;  %v1766_v37 = vrot.slane %v1765_v5, 4  ;;  %v1773_v34 = vrot.slane %v1772_v31, 4 }
 0x1aa   :  { %v1779_v38 = vsel %vm1540_vm6, %v1501_v30, -inf  ;;  %v1786_v12 = vsel %vm1540_vm6, %v1503_v28, -inf  ;;  %v494_v48 = vcombine.high %v3972_v22, %v3972_v22  ;;  %v4309_v51 = vsel %vm1043_vm5, %v1757_v60, -inf }
 0x1ab   :  { %v4312_v53 = vsel %vm1043_vm5, %v951_v20, -inf  ;;  %v1767_v3 = vmax.f32 %v1765_v5, %v1766_v37  ;;  %v1780_v17 = vrot.slane %v1779_v38, 4  ;;  %v1774_v45 = vmax.f32 %v1772_v31, %v1773_v34 }
 0x1ac   :  { %v1141_v58 = vmax.f32 %v4284_v26, %v4312_v53  ;;  %v1787_v47 = vrot.slane %v1786_v12, 4  ;;  %v931_v30 = vsel %vm538_vm4, %v3972_v22, -inf  ;;  %v958_v40 = vmax.f32 %v956_v1, %v957_v62 }
 0x1ad   :  { %v1768_v11 = vrot.slane %v1767_v3, 2  ;;  %v1781_v42 = vmax.f32 %v1779_v38, %v1780_v17  ;;  %v932_v63 = vrot.slane %v931_v30, 4  ;;  %v1775_v36 = vrot.slane %v1774_v45, 2 }
 0x1ae   :  { %v1788_v28 = vmax.f32 %v1786_v12, %v1787_v47  ;;  %v938_v60 = vsel %vm538_vm4, %v494_v48, -inf  ;;  %v1144_v35 = vmax.f32 %v4198_v54, %v4294_v25  ;;  %v1092_v22 = vmax.f32 %v4060_v16, %v4108_v55 }
 0x1af   :  { %v1769_v5 = vmax.f32 %v1767_v3, %v1768_v11  ;;  %v1782_v20 = vrot.slane %v1781_v42, 2  ;;  %v933_v37 = vmax.f32 %v931_v30, %v932_v63  ;;  %v939_v56 = vrot.slane %v938_v60, 4 }
 0x1b0   :  { %v1776_v31 = vmax.f32 %v1774_v45, %v1775_v36  ;;  %v1789_v34 = vrot.slane %v1788_v28, 2  ;;  %v1096_v1 = vsel %vm1043_vm5, %v4076_v43, -inf  ;;  %v4939_v54 = vmax.f32 %v4071_v29, %v4074_v15 }
 0x1b1   :  { %v1770_v62 = vrot.slane %v1769_v5, 1  ;;  %v4325_v38 = vmax.f32 %v1781_v42, %v1782_v20  ;;  %v934_v12 = vrot.slane %v933_v37, 2  ;;  %v940_v48 = vmax.f32 %v938_v60, %v939_v56 }
 0x1b2   :  { %v1777_v17 = vrot.slane %v1776_v31, 1  ;;  %v4327_v47 = vmax.f32 %v1788_v28, %v1789_v34  ;;  %v1097_v25 = vmax.f32 %v4939_v54, %v1096_v1  ;;  %v1098_v3 = vsel %vm1043_vm5, %v4090_v13, -inf }
 0x1b3   :  { %v4334_v45 = vmax.f32 %v1762_v23, %v1763_v19  ;;  %v4337_v16 = vsel %vm1043_vm5, %v958_v40, -inf  ;;  %v935_v43 = vmax.f32 %v933_v37, %v934_v12  ;;  %v941_v55 = vrot.slane %v940_v48, 2 }
 0x1b4   :  { %v4339_v30 = vmax.f32 %v1769_v5, %v1770_v62  ;;  %v4341_v56 = vmax.f32 %v1776_v31, %v1777_v17  ;;  %v1784_v11 = vrot.slane %v4325_v38, 1  ;;  %v1099_v42 = vmax.f32 %v1097_v25, %v1098_v3 }
 0x1b5   :  { %v936_v15 = vrot.slane %v935_v43, 1  ;;  %v942_v63 = vmax.f32 %v940_v48, %v941_v55  ;;  %v4940_v13 = vmax.f32 %v3974_v57, %v3951_v4  ;;  %v1181_v19 = vadd.f32 %v4174_v9, %v1092_v22 }
 0x1b6   :  { %v1182_v40 = vadd.f32 %v4174_v9, %v1099_v42  ;;  %v4941_v60 = vrot.slane %v3828_v49, 7  ;;  %v1885_v20 = vrot.slane %v4014_v50, 5  ;;  %v4942_v37 = vrot.slane %v3865_v41, 6 }
 0x1b7   :  { %v1180_v23 = vadd.f32 %v4174_v9, %v4940_v13  ;;  %v937_v36 = vmax.f32 %v935_v43, %v936_v15  ;;  %v943_v28 = vrot.slane %v942_v63, 1  ;;  %v1888_v57 = vrot.slane %v3955_v27, 4 }
 0x1b8   :  { %v1881_v5 = vsel %vm1880_vm7, %v4941_v60, %v3853_v21  ;;  %v1894_v21 = vrot.slane %v1181_v19, 2  ;;  %v1897_v27 = vrot.slane %v1182_v40, 1  ;;  %v973_v54 = vsel %vm538_vm4, %v4043_v8, -inf }
 0x1b9   :  { %v1884_v4 = vsel %vm1883_vm8, %v4942_v37, %v1881_v5  ;;  %v944_v31 = vmax.f32 %v942_v63, %v943_v28  ;;  %v1145_v34 = vsel %vm1043_vm5, %v937_v36, -inf  ;;  %v1891_v1 = vrot.slane %v1180_v23, 3  ;;  %v4396_v5 = vld [vmem:[%s4886_s4 + $0x1] ss:$0 sm:$0xff]  ;;  %v4944_v37 = vld [vmem:[#allocation10_spill] sm:$0xff] }
 0x1ba   :  { %v1887_v22 = vsel %vm1886_vm9, %v1885_v20, %v1884_v4  ;;  %v4362_v62 = vmax.f32 %v1144_v35, %v1145_v34  ;;  %v497_v35 = vcombine.high %v4043_v8, %v4043_v8  ;;  %v496_v25 = vcombine.high %v4067_v7, %v4067_v7  ;;  %v4943_v20 = vld [vmem:[#allocation7_spill] sm:$0xff] }
 0x1bb   :  { %v1890_v49 = vsel %vm1889_vm10, %v1888_v57, %v1887_v22  ;;  %v4366_v41 = vsel %vm1043_vm5, %v944_v31, -inf  ;;  %v959_v3 = vsel %vm538_vm4, %v4067_v7, -inf  ;;  %v974_v55 = vrot.slane %v973_v54, 4  ;;  %v4946_v57 = vld [vmem:[#allocation9_spill] sm:$0xff] }
 0x1bc   :  { %v1893_v50 = vsel %vm1892_vm11, %v1891_v1, %v1890_v49  ;;  %v1134_v12 = vmax.f32 %v4269_v18, %v4366_v41  ;;  %v980_v42 = vsel %vm538_vm4, %v497_v35, -inf  ;;  %v960_v15 = vrot.slane %v959_v3, 4  ;;  %v4964_v41 = vld [vmem:[#allocation19_spill] sm:$0xff] }
 0x1bd   :  { %v1896_v48 = vsel %vm1895_vm12, %v1894_v21, %v1893_v50  ;;  %v981_v63 = vrot.slane %v980_v42, 4  ;;  %v966_v13 = vsel %vm538_vm4, %v496_v25, -inf  ;;  %v1105_v8 = vsel %vm1043_vm5, %v4105_v44, -inf  ;;  %v4949_v21 = vld [vmem:[#allocation12_spill] sm:$0xff]  ;;  %v4950_v50 = vld [vmem:[#allocation13_spill] sm:$0xff] }
 0x1be   :  { %v4375_v17 = vsel %vm1898_vm13, %v1897_v27, %v1896_v48  ;;  %v1812_v23 = vsel %vm1043_vm5, %v4039_v32, -inf  ;;  %v975_v19 = vmax.f32 %v973_v54, %v974_v55  ;;  %v961_v40 = vmax.f32 %v959_v3, %v960_v15  ;;  %v4947_v32 = vld [vmem:[#allocation11_spill] sm:$0xff]  ;;  %v4952_v54 = vld [vmem:[#allocation5_spill] sm:$0xff]  ;;  %v4954_v3 = vld [vmem:[#allocation6_spill] sm:$0xff] }
 0x1bf   :  { %v2016_v43 = vsel %vm1043_vm5, %v4375_v17, 0.0  ;;  %v967_v7 = vrot.slane %v966_v13, 4  ;;  %v1106_v36 = vmax.f32 %v4096_v46, %v1105_v8  ;;  %v982_v28 = vmax.f32 %v980_v42, %v981_v63  ;;  %v4956_v15 = vld [vmem:[#allocation8_spill] sm:$0xff] }
 0x1c0   :  { %2017 = vadd.xlane.f32.xlu1 %v2016_v43  ;;  %v1813_v60 = vmax.f32 %v4052_v52, %v1812_v23  ;;  %v4945_v4 = vmax.f32 %v4943_v20, %v4944_v37  ;;  %v4948_v31 = vmax.f32 %v4946_v57, %v4947_v32  ;;  %v4407_v46 = vmax.f32 %v4325_v38, %v1784_v11 }
 0x1c1   :  { %v976_v22 = vrot.slane %v975_v19, 2  ;;  %v962_v52 = vrot.slane %v961_v40, 2  ;;  %v968_v1 = vmax.f32 %v966_v13, %v967_v7  ;;  %v983_v49 = vrot.slane %v982_v28, 2 }
 0x1c2   :  { %v1855_v44 = vadd.f32 %v4396_v5, %v4945_v4  ;;  %v1856_v34 = vadd.f32 %v4396_v5, %v4948_v31  ;;  %v4951_v27 = vmax.f32 %v4949_v21, %v4950_v50  ;;  %v1858_v35 = vadd.f32 %v4396_v5, %v1813_v60 }
 0x1c3   :  { %v4953_v25 = vrot.slane %v4952_v54, 7  ;;  %v4955_v43 = vrot.slane %v4954_v3, 6  ;;  %v977_v42 = vmax.f32 %v975_v19, %v976_v22  ;;  %v963_v38 = vmax.f32 %v961_v40, %v962_v52  ;;  %v4958_v19 = vld [vmem:[#allocation16_spill] sm:$0xff] }
 0x1c4   :  { %v1857_v48 = vadd.f32 %v4396_v5, %v4951_v27  ;;  %v969_v11 = vrot.slane %v968_v1, 2  ;;  %v4957_v63 = vrot.slane %v4956_v15, 5  ;;  %v984_v8 = vmax.f32 %v982_v28, %v983_v49 }
 0x1c5   :  { %v1913_v55 = vsel %vm1883_vm8, %v4955_v43, %v4953_v25  ;;  %v1916_v23 = vrot.slane %v1855_v44, 4  ;;  %v1918_v7 = vrot.slane %v1856_v34, 3  ;;  %v978_v37 = vrot.slane %v977_v42, 1 }
 0x1c6   :  { %v1915_v13 = vsel %vm1886_vm9, %v4957_v63, %v1913_v55  ;;  %v1920_v20 = vrot.slane %v1857_v48, 2  ;;  %v964_v4 = vrot.slane %v963_v38, 1  ;;  %v970_v60 = vmax.f32 %v968_v1, %v969_v11 }
 0x1c7   :  { %v1922_v57 = vrot.slane %v1858_v35, 1  ;;  %v985_v32 = vrot.slane %v984_v8, 1  ;;  %v1183_v31 = vadd.f32 %v4174_v9, %v1106_v36  ;;  %v1917_v21 = vsel %vm1889_vm10, %v1916_v23, %v1915_v13  ;;  %v4960_v23 = vld [vmem:[#allocation18_spill] sm:$0xff] }
 0x1c8   :  { %v499_v40 = vcombine.high %v4958_v19, %v4958_v19  ;;  %v965_v22 = vmax.f32 %v963_v38, %v964_v4  ;;  %v971_v52 = vrot.slane %v970_v60, 1  ;;  %v1919_v50 = vsel %vm1892_vm11, %v1918_v7, %v1917_v21  ;;  %v4959_v38 = vld [vmem:[#allocation17_spill] sm:$0xff] }
 0x1c9   :  { %v986_v28 = vmax.f32 %v984_v8, %v985_v32  ;;  %v1921_v44 = vsel %vm1895_vm12, %v1920_v20, %v1919_v50  ;;  %v1001_v34 = vsel %vm538_vm4, %v4958_v19, -inf  ;;  %v4433_v36 = vsel %vm1043_vm5, %v4341_v56, -inf }
 0x1ca   :  { %v1008_v1 = vsel %vm538_vm4, %v499_v40, -inf  ;;  %v4435_v49 = vmax.f32 %v977_v42, %v978_v37  ;;  %v1149_v27 = vsel %vm1043_vm5, %v965_v22, -inf  ;;  %v1923_v48 = vsel %vm1898_vm13, %v1922_v57, %v1921_v44  ;;  %v4961_v37 = vld [vmem:[#allocation20_spill] sm:$0xff] }
 0x1cb   :  { %v1150_v35 = vsel %vm1043_vm5, %v986_v28, -inf  ;;  %v4440_v54 = vsel %vm1980_vm14, %v1183_v31, %v1923_v48  ;;  %v1002_v25 = vrot.slane %v1001_v34, 4  ;;  %v1009_v3 = vrot.slane %v1008_v1, 4 }
 0x1cc   :  { %v1151_v43 = vmax.f32 %v1149_v27, %v1150_v35  ;;  %v2019_v55 = vsel %vm1043_vm5, %v4440_v54, 0.0  ;;  %v498_v56 = vcombine.high %v4959_v38, %v4959_v38  ;;  %v987_v42 = vsel %vm538_vm4, %v4959_v38, -inf  ;;  %v4459_v35 = vpop.xlane.xlu0 %1990 }
 0x1cd   :  { %v972_v11 = vmax.f32 %v970_v60, %v971_v52  ;;  %2020 = vadd.xlane.f32.xlu1 %v2019_v55  ;;  %v1003_v15 = vmax.f32 %v1001_v34, %v1002_v25  ;;  %v1010_v63 = vmax.f32 %v1008_v1, %v1009_v3  ;;  %v988_v13 = vrot.slane %v987_v42, 4 }
 0x1ce   :  { %v994_v8 = vsel %vm538_vm4, %v498_v56, -inf  ;;  %v501_v7 = vcombine.high %v4960_v23, %v4960_v23  ;;  %v1029_v20 = vsel %vm538_vm4, %v4960_v23, -inf  ;;  %v500_v4 = vcombine.high %v4961_v37, %v4961_v37 }
 0x1cf   :  { %v1004_v57 = vrot.slane %v1003_v15, 2  ;;  %v1011_v32 = vrot.slane %v1010_v63, 2  ;;  %v989_v31 = vmax.f32 %v987_v42, %v988_v13  ;;  %v995_v21 = vrot.slane %v994_v8, 4 }
 0x1d0   :  { %v1030_v60 = vrot.slane %v1029_v20, 4  ;;  %v1036_v19 = vsel %vm538_vm4, %v501_v7, -inf  ;;  %v1015_v40 = vsel %vm538_vm4, %v4961_v37, -inf  ;;  %v1022_v22 = vsel %vm538_vm4, %v500_v4, -inf }
 0x1d1   :  { %v1005_v52 = vmax.f32 %v1003_v15, %v1004_v57  ;;  %v1012_v50 = vmax.f32 %v1010_v63, %v1011_v32  ;;  %v990_v28 = vrot.slane %v989_v31, 2  ;;  %v996_v44 = vmax.f32 %v994_v8, %v995_v21 }
 0x1d2   :  { %v1031_v34 = vmax.f32 %v1029_v20, %v1030_v60  ;;  %v1037_v1 = vrot.slane %v1036_v19, 4  ;;  %v1016_v27 = vrot.slane %v1015_v40, 4  ;;  %v1023_v48 = vrot.slane %v1022_v22, 4 }
 0x1d3   :  { %v1006_v25 = vrot.slane %v1005_v52, 1  ;;  %v1013_v3 = vrot.slane %v1012_v50, 1  ;;  %v991_v55 = vmax.f32 %v989_v31, %v990_v28  ;;  %v997_v38 = vrot.slane %v996_v44, 2 }
 0x1d4   :  { %v1032_v56 = vrot.slane %v1031_v34, 2  ;;  %v1038_v42 = vmax.f32 %v1036_v19, %v1037_v1  ;;  %v1017_v13 = vmax.f32 %v1015_v40, %v1016_v27  ;;  %v1024_v23 = vmax.f32 %v1022_v22, %v1023_v48  ;;  %v1994_v22 = vpop.xlane.xlu0 %1993 }
 0x1d5   :  { %v1007_v7 = vmax.f32 %v1005_v52, %v1006_v25  ;;  %v1014_v37 = vmax.f32 %v1012_v50, %v1013_v3  ;;  %v992_v15 = vrot.slane %v991_v55, 1  ;;  %v998_v63 = vmax.f32 %v996_v44, %v997_v38 }
 0x1d6   :  { %v1033_v4 = vmax.f32 %v1031_v34, %v1032_v56  ;;  %v1039_v8 = vrot.slane %v1038_v42, 2  ;;  %v1018_v20 = vrot.slane %v1017_v13, 2  ;;  %v1025_v57 = vrot.slane %v1024_v23, 2 }
 0x1d7   :  { %v1152_v32 = vsel %vm1043_vm5, %v1007_v7, -inf  ;;  %v993_v21 = vmax.f32 %v991_v55, %v992_v15  ;;  %v999_v60 = vrot.slane %v998_v63, 1  ;;  %v1156_v29 = vsel %vm1043_vm5, %v972_v11, -inf }
 0x1d8   :  { %v4463_v31 = vmax.f32 %v1151_v43, %v1152_v32  ;;  %v1034_v28 = vrot.slane %v1033_v4, 1  ;;  %v1040_v19 = vmax.f32 %v1038_v42, %v1039_v8  ;;  %v1019_v40 = vmax.f32 %v1017_v13, %v1018_v20 }
 0x1d9   :  { %v1159_v52 = vsel %vm1043_vm5, %v1014_v37, -inf  ;;  %v1000_v50 = vmax.f32 %v998_v63, %v999_v60  ;;  %v1157_v44 = vsel %vm1043_vm5, %v993_v21, -inf  ;;  %v1026_v34 = vmax.f32 %v1024_v23, %v1025_v57  ;;  %v4962_v21 = vld [vmem:[#allocation14_spill] sm:$0xff] }
 0x1da   :  { %v1158_v1 = vmax.f32 %v1156_v29, %v1157_v44  ;;  %v1035_v27 = vmax.f32 %v1033_v4, %v1034_v28  ;;  %v1041_v48 = vrot.slane %v1040_v19, 1  ;;  %v1020_v25 = vrot.slane %v1019_v40, 1  ;;  %v4474_v29 = vld [vmem:[%s4884_s2 + $0x8] sm:$0xff]  ;;  %v4963_v28 = vld [vmem:[#allocation15_spill] sm:$0xff] }
 0x1db   :  { %v1163_v3 = vsel %vm1043_vm5, %v4435_v49, -inf  ;;  %v1164_v43 = vsel %vm1043_vm5, %v1000_v50, -inf  ;;  %v1027_v11 = vrot.slane %v1026_v34, 1  ;;  %v1997_v55 = vmul.f32 0.015625, %v1994_v22 }
 0x1dc   :  { %v1042_v38 = vmax.f32 %v1040_v19, %v1041_v48  ;;  %v1160_v56 = vmax.f32 %v1158_v1, %v1159_v52  ;;  %v1161_v42 = vsel %vm1043_vm5, %v1035_v27, -inf  ;;  %v1021_v13 = vmax.f32 %v1019_v40, %v1020_v25 }
 0x1dd   :  { %v1028_v7 = vmax.f32 %v1026_v34, %v1027_v11  ;;  %v1165_v37 = vmax.f32 %v1163_v3, %v1164_v43  ;;  %v4477_v23 = vsub.f32 %v4474_v29, %v1997_v55  ;;  %v1148_v49 = vmax.f32 %v4362_v62, %v4337_v16 }
 0x1de   :  { %v1162_v15 = vmax.f32 %v1160_v56, %v1161_v42  ;;  %v1168_v63 = vsel %vm1043_vm5, %v1042_v38, -inf  ;;  %v1166_v4 = vsel %vm1043_vm5, %v1021_v13, -inf  ;;  %v1187_v8 = vadd.f32 %v4174_v9, %v1134_v12 }
 0x1df   :  { %v1154_v20 = vsel %vm1043_vm5, %v1028_v7, -inf  ;;  %v1167_v57 = vmax.f32 %v1165_v37, %v1166_v4  ;;  %v1188_v32 = vadd.f32 %v4174_v9, %v1141_v58  ;;  %v1189_v16 = vadd.f32 %v4174_v9, %v1148_v49 }
 0x1e0   :  { %v1155_v62 = vmax.f32 %v4463_v31, %v1154_v20  ;;  %v1814_v60 = vsel %vm1043_vm5, %v4962_v21, -inf  ;;  %v1817_v18 = vsel %vm1043_vm5, %v4963_v28, -inf  ;;  %v1818_v12 = vsel %vm1043_vm5, %v4964_v41, -inf  ;;  %v4970_v21 = vld [vmem:[#allocation23_spill] sm:$0xff] }
 0x1e1   :  { %v1816_v19 = vmax.f32 %v1814_v60, %v4168_v10  ;;  %v1819_v40 = vmax.f32 %v1817_v18, %v1818_v12  ;;  %v4965_v26 = vrot.slane %v4195_v2, 6  ;;  %v4966_v53 = vrot.slane %v4177_v59, 5  ;;  %v4973_v18 = vld [vmem:[#allocation24_spill] sm:$0xff] }
 0x1e2   :  { %v1942_v22 = vrot.slane %v1187_v8, 3  ;;  %v4967_v31 = vrot.slane %v4192_v61, 4  ;;  %v1944_v50 = vrot.slane %v1188_v32, 2  ;;  %v1946_v44 = vrot.slane %v1189_v16, 1  ;;  %v4969_v16 = vld [vmem:[#allocation21_spill] sm:$0xff] }
 0x1e3   :  { %v1939_v58 = vsel %vm1886_vm9, %v4966_v53, %v4965_v26  ;;  %v1859_v34 = vadd.f32 %v4396_v5, %v1816_v19  ;;  %v1860_v1 = vadd.f32 %v4396_v5, %v1819_v40  ;;  %v4968_v2 = vrot.slane %v4327_v47, 1  ;;  %v4975_v19 = vld [vmem:[#allocation25_spill] sm:$0xff] }
 0x1e4   :  { %v1941_v52 = vsel %vm1889_vm10, %v4967_v31, %v1939_v58  ;;  %v1837_v61 = vmax.f32 %v4264_v6, %v4302_v39  ;;  %v1840_v48 = vmax.f32 %v4309_v51, %v4433_v36  ;;  %v1841_v25 = vsel %vm1043_vm5, %v4334_v45, -inf }
 0x1e5   :  { %v1943_v10 = vsel %vm1892_vm11, %v1942_v22, %v1941_v52  ;;  %v1792_v59 = vmax.f32 %v4327_v47, %v4968_v2  ;;  %v1924_v3 = vrot.slane %v1860_v1, 7  ;;  %v1842_v11 = vsel %vm1043_vm5, %v4407_v46, -inf }
 0x1e6   :  { %v1945_v27 = vsel %vm1895_vm12, %v1944_v50, %v1943_v10  ;;  %v1844_v47 = vsel %vm1043_vm5, %v4339_v30, -inf  ;;  %v1843_v55 = vmax.f32 %v1841_v25, %v1842_v11  ;;  %v1866_v6 = vadd.f32 %v4396_v5, %v1837_v61 }
 0x1e7   :  { %v1947_v43 = vsel %vm1898_vm13, %v1946_v44, %v1945_v27  ;;  %v1845_v38 = vsel %vm1043_vm5, %v1792_v59, -inf  ;;  %v1867_v39 = vadd.f32 %v4396_v5, %v1840_v48  ;;  %v1996_v51 = vmul.f32 0.015625, %v4459_v35 }
 0x1e8   :  { %v1925_v45 = vsel %vm1880_vm7, %v1924_v3, %v1859_v34  ;;  %v1846_v36 = vmax.f32 %v1844_v47, %v1845_v38  ;;  %v1169_v56 = vmax.f32 %v1167_v57, %v1168_v63  ;;  %v1868_v46 = vadd.f32 %v4396_v5, %v1843_v55  ;;  %v2082_v55 = vld [vmem:[%s4887_s5] sm:$0xff]  ;;  %v2083_v38 = vld [vmem:[%s4887_s5 + $0x8] sm:$0xff] }
 0x1e9   :  { %v4533_v42 = vsel %vm1982_vm15, %v1925_v45, %v1947_v43  ;;  %v1972_v13 = vrot.slane %v1867_v39, 7  ;;  %v2001_v30 = vmul.f32 %v4477_v23, %v4477_v23  ;;  %v1190_v35 = vadd.f32 %v4174_v9, %v1155_v62  ;;  %v4972_v62 = vld [vmem:[#allocation22_spill] sm:$0xff] }
 0x1ea   :  { %v2022_v7 = vsel %vm1043_vm5, %v4533_v42, 0.0  ;;  %v1869_v37 = vadd.f32 %v4396_v5, %v1846_v36  ;;  %v1191_v49 = vadd.f32 %v4174_v9, %v1162_v15  ;;  %v1974_v4 = vrot.slane %v1868_v46, 6  ;;  %v2086_v36 = vld [vmem:[%s4887_s5 + $0x20] sm:$0xff] }
 0x1eb   :  { %2023 = vadd.xlane.f32.xlu0 %v2022_v7  ;;  %v1973_v63 = vsel %vm1880_vm7, %v1972_v13, %v1866_v6  ;;  %v1192_v8 = vadd.f32 %v4174_v9, %v1169_v56  ;;  %v1832_v20 = vsel %vm1043_vm5, %v4253_v33, -inf  ;;  %v4971_v60 = vmax.f32 %v4969_v16, %v4970_v21  ;;  %v4976_v9 = vld [vmem:[#allocation26_spill] sm:$0xff]  ;;  %v2084_v6 = vld [vmem:[%s4887_s5 + $0x10] sm:$0xff]  ;;  %v2087_v56 = vld [vmem:[%s4887_s5 + $0x28] sm:$0xff] }
 0x1ec   :  { %v1976_v57 = vrot.slane %v1869_v37, 5  ;;  %v1834_v32 = vmax.f32 %v1832_v20, %v4297_v14  ;;  %v4974_v15 = vmax.f32 %v4972_v62, %v4973_v18  ;;  %v1975_v12 = vsel %vm1883_vm8, %v1974_v4, %v1973_v63  ;;  %v2088_v13 = vld [vmem:[%s4887_s5 + $0x30] sm:$0xff] }
 0x1ed   :  { %v1861_v28 = vadd.f32 %v4396_v5, %v4971_v60  ;;  %v4977_v40 = vmax.f32 %v4975_v19, %v4976_v9  ;;  %v4978_v14 = vmax.f32 %v4256_v0, %v4272_v24  ;;  %v1948_v53 = vrot.slane %v1191_v49, 7  ;;  %v4575_v0 = vld [vmem:[%s4884_s2] sm:$0xff] }
 0x1ee   :  { %v1862_v41 = vadd.f32 %v4396_v5, %v4974_v15  ;;  %v4566_v58 = vsel %vm1886_vm9, %v1976_v57, %v1975_v12  ;;  %v1865_v22 = vadd.f32 %v4396_v5, %v1834_v32  ;;  %v1950_v31 = vrot.slane %v1192_v8, 6 }
 0x1ef   :  { %v1863_v33 = vadd.f32 %v4396_v5, %v4977_v40  ;;  %v1864_v26 = vadd.f32 %v4396_v5, %v4978_v14  ;;  %v1963_v52 = vrot.slane %v1861_v28, 5  ;;  %v2028_v50 = vsel %vm538_vm4, %v4566_v58, 0.0 }
 0x1f0   :  { %v1949_v44 = vsel %vm1880_vm7, %v1948_v53, %v1190_v35  ;;  %v1964_v34 = vrot.slane %v1862_v41, 4  ;;  %v4578_v24 = vsub.f32 %v4575_v0, %v1996_v51  ;;  %2029 = vadd.xlane.f32.xlu0 %v2028_v50  ;;  %v1970_v2 = vrot.slane %v1865_v22, 1  ;;  %v2085_v51 = vld [vmem:[%s4887_s5 + $0x18] sm:$0xff]  ;;  %v2090_v50 = vld [vmem:[%s4887_s5 + $0x40] sm:$0xff] }
 0x1f1   :  { %v1966_v1 = vrot.slane %v1863_v33, 3  ;;  %v1951_v5 = vsel %vm1883_vm8, %v1950_v31, %v1949_v44  ;;  %v1968_v10 = vrot.slane %v1864_v26, 2  ;;  %v2005_v59 = vsel %vm1988_vm3, %v2001_v30, 0.0  ;;  %v2089_v30 = vld [vmem:[%s4887_s5 + $0x38] sm:$0xff]  ;;  %v2091_v44 = vld [vmem:[%s4887_s5 + $0x48] sm:$0xff] }
 0x1f2   :  { %v1965_v27 = vsel %vm1889_vm10, %v1964_v34, %v1963_v52  ;;  %v2000_v3 = vmul.f32 %v4578_v24, %v4578_v24  ;;  %v3318_v39 = vpack.c.bf16 %v2083_v38, %v2082_v55  ;;  %v3322_v45 = vpack.c.bf16 %v2085_v51, %v2084_v6  ;;  %v2097_v51 = vld [vmem:[%s4887_s5 + $0x78] sm:$0xff] }
 0x1f3   :  { %v1967_v61 = vsel %vm1892_vm11, %v1966_v1, %v1965_v27  ;;  %v3326_v46 = vpack.c.bf16 %v2087_v56, %v2086_v36  ;;  %v3330_v7 = vpack.c.bf16 %v2089_v30, %v2088_v13  ;;  %v4979_v37 = vmov 0.0|0.0   ;;  %v2093_v27 = vld [vmem:[%s4887_s5 + $0x58] sm:$0xff] }
 0x1f4   :  { %v1969_v48 = vsel %vm1895_vm12, %v1968_v10, %v1967_v61  ;;  %2006 = vadd.xlane.f32.xlu0 %v2005_v59  ;;  %v2002_v47 = vsel %vm1988_vm3, %v2000_v3, 0.0  ;;  %3319 = vmatprep.subr.bf16.mxu1 %v3318_v39  ;;  %v3335_v10 = vpack.c.bf16 %v2091_v44, %v2090_v50  ;;  %v2092_v59 = vld [vmem:[%s4887_s5 + $0x50] sm:$0xff]  ;;  %v2094_v3 = vld [vmem:[%s4887_s5 + $0x60] sm:$0xff] }
 0x1f5   :  { %v1971_v25 = vsel %vm1898_vm13, %v1970_v2, %v1969_v48  ;;  %3321 = vmatpush3.bf16.msra.mxu1 %v3318_v39  ;;  %v3338_v61 = vpack.c.bf16 %v2093_v27, %v2092_v59  ;;  %v4980_v48 = vmov 0.0   ;;  %v2096_v39 = vld [vmem:[%s4887_s5 + $0x70] sm:$0xff]  ;;  %v2969_v59 = vld [vmem:[%s4888_s6 + $0x2] ss:$0 sm:$0xff]  ;;  %v4734_v27 = vld [vmem:[%s4891_s9 + $0x8] sm:$0xff] }
 0x1f6   :  { %v1985_v43 = vsel %vm1984_vm0, %v1951_v5, %v1971_v25  ;;  %3323 = vmatprep.subr.bf16.mxu1 %v3322_v45  ;;  %v3344_v36 = vpack.c.bf16 %v2097_v51, %v2096_v39 }
 0x1f7   :  { %v2025_v11 = vsel %vm1043_vm5, %v1985_v43, 0.0 }
 0x1f8   :  { %2026 = vadd.xlane.f32.xlu1 %v2025_v11 }
 0x1f9   :  { %3325 = vmatpush3.bf16.msra.mxu1 %v3322_v45 }
 0x1fa   :  { %3327 = vmatprep.subr.bf16.mxu1 %v3326_v46 }
 0x1fc   :  { %2003 = vadd.xlane.f32.xlu1 %v2002_v47 }
 0x1fd   :  { %3329 = vmatpush3.bf16.msra.mxu1 %v3326_v46 }
 0x1fe   :  { %3331 = vmatprep.subr.bf16.mxu1 %v3330_v7 }
 0x201   :  { %3333 = vmatpush3.bf16.msra.mxu1 %v3330_v7 }
 0x202   :  { %3334 = vmatprep.subr.bf16.mxu1 %v4979_v37 }
 0x24d   :  { %v2018_v35 = vpop.xlane.xlu1 %2017 }
 0x24e   :  { %v2032_v49 = vmul.f32 0.03125, %v2018_v35 }
 0x250   :  { %v4616_v63 = vsub.f32 %v4375_v17, %v2032_v49 }
 0x252   :  { %v2042_v4 = vmul.f32 %v4616_v63, %v4616_v63 }
 0x254   :  { %v2047_v8 = vsel %vm1043_vm5, %v2042_v4, 0.0 }
 0x255   :  { %2048 = vadd.xlane.f32.xlu1 %v2047_v8 }
 0x25a   :  { %v2021_v20 = vpop.xlane.xlu1 %2020 }
 0x25b   :  { %v2033_v57 = vmul.f32 0.03125, %v2021_v20 }
 0x25d   :  { %v4622_v32 = vsub.f32 %v4440_v54, %v2033_v57 }
 0x25f   :  { %v2043_v16 = vmul.f32 %v4622_v32, %v4622_v32 }
 0x261   :  { %v2050_v21 = vsel %vm1043_vm5, %v2043_v16, 0.0 }
 0x262   :  { %2051 = vadd.xlane.f32.xlu0 %v2050_v21 }
 0x278   :  { %v2024_v60 = vpop.xlane.xlu0 %2023 }
 0x279   :  { %v2034_v17 = vmul.f32 0.03125, %v2024_v60 }
 0x27b   :  { %v4628_v28 = vsub.f32 %v4533_v42, %v2034_v17  ;;  %v2960_v17 = vld [vmem:[%s4888_s6] ss:$0 sm:$0xff] }
 0x27d   :  { %v2030_v62 = vpop.xlane.xlu0 %2029  ;;  %v2044_v18 = vmul.f32 %v4628_v28, %v4628_v28 }
 0x27e   :  { %v2036_v15 = vmul.f32 0.03125, %v2030_v62 }
 0x27f   :  { %v2053_v41 = vsel %vm1043_vm5, %v2044_v18, 0.0 }
 0x280   :  { %v4634_v54 = vsub.f32 %v4566_v58, %v2036_v15  ;;  %2054 = vadd.xlane.f32.xlu1 %v2053_v41  ;;  %v4718_v15 = vld [vmem:[%s4891_s9] sm:$0xff] }
 0x281   :  { %v2007_v12 = vpop.xlane.xlu0 %2006 }
 0x282   :  { %v2046_v19 = vmul.f32 %v4634_v54, %v4634_v54  ;;  %v2009_v9 = vmul.f32 0.015625, %v2007_v12 }
 0x284   :  { %v2059_v42 = vsel %vm538_vm4, %v2046_v19, 0.0  ;;  %v2011_v26 = vadd.f32 1e-05, %v2009_v9  ;;  %v2963_v9 = vld [vmem:[%s4888_s6 + $0x1] ss:$0 sm:$0xff]  ;;  %vm2557_vm4 = vcmask 293888  }
 0x285   :  { %v2027_v40 = vpop.xlane.xlu1 %2026  ;;  %2060 = vadd.xlane.f32.xlu1 %v2059_v42 }
 0x286   :  { %v2035_v33 = vmul.f32 0.03125, %v2027_v40  ;;  %3381 = vrsqrt.f32 %v2011_v26 }
 0x288   :  { %v4639_v14 = vsub.f32 %v1985_v43, %v2035_v33  ;;  %v2095_v43 = vld [vmem:[%s4887_s5 + $0x68] sm:$0xff] }
 0x289   :  { %v2004_v53 = vpop.xlane.xlu1 %2003  ;;  %v3341_v38 = vpack.c.bf16 %v2095_v43, %v2094_v3 }
 0x28a   :  { %v2008_v22 = vmul.f32 0.015625, %v2004_v53  ;;  %v2045_v58 = vmul.f32 %v4639_v14, %v4639_v14 }
 0x28c   :  { %v2010_v31 = vadd.f32 1e-05, %v2008_v22  ;;  %v2056_v52 = vsel %vm1043_vm5, %v2045_v58, 0.0 }
 0x28d   :  { %2057 = vadd.xlane.f32.xlu0 %v2056_v52 }
 0x28e   :  { %3383 = vrsqrt.f32 %v2010_v31 }
 0x290   :  { %v3382_v34 = vpop.eup %3381 }
 0x291   :  { %v2015_v2 = vmul.f32 %v3382_v34, %v4477_v23 }
 0x298   :  { %v3384_v1 = vpop.eup %3383 }
 0x299   :  { %v2014_v5 = vmul.f32 %v3384_v1, %v4578_v24 }
 0x29b   :  { %3211 = vmatprep.mubr.msk.f32.mxu1 %vm1988_vm3, %v2014_v5 }
 0x29c   :  { %3212 = vmatmul.mubr.msk.f32.vlgmr.msra.gmra.mrb[18].mxu1 %vm1988_vm3, %v2015_v2 }
 0x29d   :  { %3336 = vmatpush3.bf16.msra.mxu1 %v3335_v10  ;;  %3222 = vmatprep.mubr.msk.f32.mxu1 %vm3456_vm1, %v4980_v48 }
 0x29e   :  { %3337 = vmatprep.subr.bf16.mxu1 %v4979_v37 }
 0x2a1   :  { %3339 = vmatpush3.bf16.msra.mxu1 %v3338_v61 }
 0x2a2   :  { %3340 = vmatprep.subr.bf16.mxu1 %v4979_v37 }
 0x2e2   :  { %v2049_v23 = vpop.xlane.xlu1 %2048 }
 0x2e3   :  { %v2062_v24 = vmul.f32 0.03125, %v2049_v23 }
 0x2e5   :  { %v2067_v25 = vadd.f32 1e-05, %v2062_v24 }
 0x2e7   :  { %3385 = vrsqrt.f32 %v2067_v25  ;;  %v4739_v25 = vld [vmem:[%s4891_s9 + $0x10] sm:$0xff] }
 0x2ef   :  { %v2052_v11 = vpop.xlane.xlu0 %2051 }
 0x2f0   :  { %v2063_v55 = vmul.f32 0.03125, %v2052_v11 }
 0x2f1   :  { %v3386_v47 = vpop.eup %3385 }
 0x2f2   :  { %v2077_v6 = vmul.f32 %v3386_v47, %v4616_v63  ;;  %v2068_v45 = vadd.f32 1e-05, %v2063_v55  ;;  %v4747_v55 = vld [vmem:[%s4891_s9 + $0x18] sm:$0xff] }
 0x2f4   :  { %3223 = vmatmul.mubr.msk.f32.vlgmr.msra.gmra.mrb[20].mxu1 %vm1043_vm5, %v2077_v6  ;;  %3387 = vrsqrt.f32 %v2068_v45 }
 0x2f5   :  { %3225 = vmatprep.mubr.msk.f32.mxu1 %vm3456_vm1, %v4980_v48  ;;  %3342 = vmatpush3.bf16.msra.mxu1 %v3341_v38 }
 0x2f6   :  { %3343 = vmatprep.subr.bf16.mxu1 %v4979_v37 }
 0x2f9   :  { %3345 = vmatpush3.bf16.msra.mxu1 %v3344_v36  ;;  %v4762_v36 = vld [vmem:[%s4891_s9 + $0x28] sm:$0xff] }
 0x2fe   :  { %v3388_v56 = vpop.eup %3387 }
 0x2ff   :  { %v2078_v46 = vmul.f32 %v3388_v56, %v4622_v32 }
 0x301   :  { %3226 = vmatmul.mubr.msk.f32.gmra.mrb[22].mxu1 %vm1043_vm5, %v2078_v46 }
 0x302   :  { %3228 = vmatprep.mubr.msk.f32.mxu1 %vm3456_vm1, %v4980_v48 }
 0x30d   :  { %v2055_v13 = vpop.xlane.xlu1 %2054 }
 0x30e   :  { %v2064_v30 = vmul.f32 0.03125, %v2055_v13 }
 0x310   :  { %v2069_v7 = vadd.f32 1e-05, %v2064_v30  ;;  %v4768_v30 = vld [vmem:[%s4891_s9 + $0x30] sm:$0xff] }
 0x312   :  { %3389 = vrsqrt.f32 %v2069_v7  ;;  %v2061_v35 = vpop.xlane.xlu1 %2060 }
 0x313   :  { %v2066_v49 = vmul.f32 0.03125, %v2061_v35 }
 0x315   :  { %v2071_v20 = vadd.f32 1e-05, %v2066_v49 }
 0x31a   :  { %v2058_v63 = vpop.xlane.xlu0 %2057 }
 0x31b   :  { %v2065_v4 = vmul.f32 0.03125, %v2058_v63 }
 0x31c   :  { %v3390_v8 = vpop.eup %3389 }
 0x31d   :  { %v2070_v37 = vadd.f32 1e-05, %v2065_v4  ;;  %v2079_v57 = vmul.f32 %v3390_v8, %v4628_v28  ;;  %v4778_v4 = vld [vmem:[%s4891_s9 + $0x38] sm:$0xff] }
 0x31f   :  { %3391 = vrsqrt.f32 %v2070_v37  ;;  %3229 = vmatmul.mubr.msk.f32.gmra.mrb[24].mxu1 %vm1043_vm5, %v2079_v57 }
 0x320   :  { %3393 = vrsqrt.f32 %v2071_v20  ;;  %3231 = vmatprep.mubr.msk.f32.mxu1 %vm3456_vm1, %v4980_v48 }
 0x329   :  { %v3392_v32 = vpop.eup %3391 }
 0x32a   :  { %v2080_v16 = vmul.f32 %v3392_v32, %v4639_v14  ;;  %v3394_v21 = vpop.eup %3393  ;;  %v2405_v32 = vld [vmem:[%s4892_s10] sm:$0xff] }
 0x32b   :  { %v2081_v60 = vmul.f32 %v3394_v21, %v4634_v54 }
 0x32c   :  { %3232 = vmatmul.mubr.msk.f32.gmra.mrb[26].mxu1 %vm1043_vm5, %v2080_v16 }
 0x32d   :  { %3234 = vmatprep.mubr.msk.f32.mxu1 %vm3456_vm1, %v4980_v48 }
 0x330   :  { %3235 = vmatmul.mubr.msk.f32.gmra.mrb[28].mxu1 %vm1043_vm5, %v2081_v60 }
 0x331   :  { %3245 = vmatprep.mubr.msk.f32.mxu1 %vm3456_vm1, %v4980_v48 }
 0x334   :  { %3246 = vmatmul.mubr.msk.f32.vlgmr.msra.gmra.mrb[30].mxu1 %vm1043_vm5, %v2077_v6  ;;  %v4753_v6 = vld [vmem:[%s4891_s9 + $0x20] sm:$0xff] }
 0x335   :  { %3248 = vmatprep.mubr.msk.f32.mxu1 %vm3456_vm1, %v4980_v48 }
 0x338   :  { %3249 = vmatmul.mubr.msk.f32.gmra.mrb[32].mxu1 %vm1043_vm5, %v2078_v46 }
 0x339   :  { %3251 = vmatprep.mubr.msk.f32.mxu1 %vm3456_vm1, %v4980_v48 }
 0x33c   :  { %3252 = vmatmul.mubr.msk.f32.gmra.mrb[34].mxu1 %vm1043_vm5, %v2079_v57  ;;  %v2406_v57 = vld [vmem:[%s4892_s10 + $0x8] sm:$0xff] }
 0x33d   :  { %3254 = vmatprep.mubr.msk.f32.mxu1 %vm3456_vm1, %v4980_v48 }
 0x340   :  { %3255 = vmatmul.mubr.msk.f32.gmra.mrb[36].mxu1 %vm1043_vm5, %v2080_v16 }
 0x341   :  { %3257 = vmatprep.mubr.msk.f32.mxu1 %vm3456_vm1, %v4980_v48  ;;  %vm3347_vm1 = vmpackc.low %vm1043_vm5, %vm1043_vm5 }
 0x344   :  { %3258 = vmatmul.mubr.msk.f32.gmra.mrb[38].mxu1 %vm1043_vm5, %v2081_v60 }
 0x36f   :  { %v3213_v28 = vpop.f32.mrb[18].mxu1 }
 0x370   :  { %v4713_v62 = vadd.f32 %v3213_v28, %v2960_v17  ;;  %v2175_v18 = vpop.f32.mrb[19].mxu1  ;;  %v2408_v28 = vld [vmem:[%s4892_s10 + $0x18] sm:$0xff] }
 0x371   :  { %v2176_v41 = vadd.f32 %v2960_v17, %v2175_v18  ;;  %v2407_v18 = vld [vmem:[%s4892_s10 + $0x10] sm:$0xff] }
 0x372   :  { %v2401_v45 = vmul.f32 %v4753_v6, %v4713_v62  ;;  %v2402_v35 = vmul.f32 %v4762_v36, %v4713_v62  ;;  %v2403_v63 = vmul.f32 %v4768_v30, %v4713_v62  ;;  %v2404_v37 = vmul.f32 %v4778_v4, %v4713_v62 }
 0x373   :  { %v2397_v54 = vmul.f32 %v4718_v15, %v2176_v41  ;;  %v2398_v3 = vmul.f32 %v4734_v27, %v2176_v41  ;;  %v2399_v47 = vmul.f32 %v4739_v25, %v2176_v41  ;;  %v2400_v39 = vmul.f32 %v4747_v55, %v2176_v41 }
 0x375   :  { %3270 = vmatprep.mubr.msk.f32.mxu0 %vm1043_vm5, %v2397_v54 }
 0x3c7   :  { %v2270_v12 = vpop.f32.mrb[20].mxu1 }
 0x3c8   :  { %v3224_v19 = vpop.f32.mrb[21].mxu1  ;;  %v2271_v42 = vadd.f32 %v2963_v9, %v2270_v12 }
 0x3d4   :  { %v2275_v40 = vpop.f32.mrb[22].mxu1 }
 0x3d5   :  { %v2276_v33 = vadd.f32 %v2963_v9, %v2275_v40  ;;  %v3227_v14 = vpop.f32.mrb[23].mxu1  ;;  %v2410_v40 = vld [vmem:[%s4892_s10 + $0x28] sm:$0xff] }
 0x3d7   :  { %v3346_v26 = vpack.c.bf16 %v2276_v33, %v2271_v42  ;;  %v2409_v33 = vld [vmem:[%s4892_s10 + $0x20] sm:$0xff] }
 0x3d9   :  { %3348 = vmatprep.subr.msk.bf16.mxu0 %vm3347_vm1, %v3346_v26 }
 0x3da   :  { %3351 = vmatpush3.bf16.xpose.msk.msra.mxu0 %vm3347_vm1, %v3346_v26 }
 0x3f2   :  { %v2280_v53 = vpop.f32.mrb[24].mxu1 }
 0x3f3   :  { %v3230_v22 = vpop.f32.mrb[25].mxu1  ;;  %v2281_v31 = vadd.f32 %v2963_v9, %v2280_v53 }
 0x3ff   :  { %v2285_v58 = vpop.f32.mrb[26].mxu1 }
 0x400   :  { %v2286_v52 = vadd.f32 %v2963_v9, %v2285_v58  ;;  %v3233_v50 = vpop.f32.mrb[27].mxu1 }
 0x401   :  { %v2411_v50 = vld [vmem:[%s4892_s10 + $0x30] sm:$0xff] }
 0x402   :  { %v3352_v44 = vpack.c.bf16 %v2286_v52, %v2281_v31  ;;  %v2412_v31 = vld [vmem:[%s4892_s10 + $0x38] sm:$0xff] }
 0x403   :  { %v2290_v34 = vpop.f32.mrb[28].mxu1 }
 0x404   :  { %v2291_v1 = vadd.f32 %v2963_v9, %v2290_v34  ;;  %v3236_v5 = vpop.f32.mrb[29].mxu1  ;;  %3354 = vmatprep.subr.msk.bf16.mxu0 %vm3347_vm1, %v3352_v44 }
 0x405   :  { %3357 = vmatpush3.bf16.xpose.msk.msra.mxu0 %vm3347_vm1, %v3352_v44 }
 0x406   :  { %3268 = vmatprep.subr.msk.mxu0 %vm1043_vm5, %v2291_v1 }
 0x407   :  { %v2365_v10 = vpop.f32.mrb[30].mxu1 }
 0x408   :  { %v3247_v2 = vpop.f32.mrb[31].mxu1  ;;  %v2366_v48 = vadd.f32 %v2969_v59, %v2365_v10 }
 0x40b   :  { %v2370_v61 = vpop.f32.mrb[32].mxu1 }
 0x40c   :  { %v2371_v23 = vadd.f32 %v2969_v59, %v2370_v61  ;;  %v3250_v24 = vpop.f32.mrb[33].mxu1 }
 0x40d   :  { %3269 = vmatpush3.xpose.msk.msra.mxu0 %vm1043_vm5, %v2291_v1 }
 0x40e   :  { %v3358_v43 = vpack.c.bf16 %v2371_v23, %v2366_v48 }
 0x40f   :  { %v2375_v11 = vpop.f32.mrb[34].mxu1 }
 0x410   :  { %v3253_v38 = vpop.f32.mrb[35].mxu1  ;;  %3271 = vmatmul.mubr.msk.f32.vlgmr.msra.gmra.mrb[36].mxu0 %vm1043_vm5, %v2398_v3  ;;  %3359 = vmatprep.subr.bf16.mxu1 %v3358_v43  ;;  %v2376_v56 = vadd.f32 %v2969_v59, %v2375_v11 }
 0x411   :  { %3273 = vmatprep.mubr.msk.f32.mxu0 %vm1043_vm5, %v2399_v47  ;;  %3361 = vmatpush3.bf16.msra.mxu1 %v3358_v43 }
 0x413   :  { %v2380_v51 = vpop.f32.mrb[36].mxu1 }
 0x414   :  { %v2381_v46 = vadd.f32 %v2969_v59, %v2380_v51  ;;  %v3256_v13 = vpop.f32.mrb[37].mxu1  ;;  %3274 = vmatmul.mubr.msk.f32.gmra.mrb[38].mxu0 %vm1043_vm5, %v2400_v39 }
 0x415   :  { %3276 = vmatprep.mubr.msk.f32.mxu0 %vm1043_vm5, %v2401_v45 }
 0x416   :  { %v3362_v7 = vpack.c.bf16 %v2381_v46, %v2376_v56 }
 0x417   :  { %v2385_v49 = vpop.f32.mrb[38].mxu1 }
 0x418   :  { %v2386_v8 = vadd.f32 %v2969_v59, %v2385_v49  ;;  %v3259_v20 = vpop.f32.mrb[39].mxu1  ;;  %3277 = vmatmul.mubr.msk.f32.gmra.mrb[40].mxu0 %vm1043_vm5, %v2402_v35  ;;  %3363 = vmatprep.subr.bf16.mxu1 %v3362_v7 }
 0x419   :  { %3279 = vmatprep.mubr.msk.f32.mxu0 %vm1043_vm5, %v2403_v63  ;;  %3365 = vmatpush3.bf16.msra.mxu1 %v3362_v7 }
 0x41a   :  { %3290 = vmatprep.subr.msk.mxu1 %vm2670_vm2, %v2386_v8 }
 0x41c   :  { %3280 = vmatmul.mubr.msk.f32.gmra.mrb[42].mxu0 %vm1043_vm5, %v2404_v37 }
 0x41d   :  { %3291 = vmatpush3.msk.msra.mxu1 %vm2670_vm2, %v2386_v8 }
 0x4e3   :  { %v3272_v16 = vpop.f32.mrb[36].mxu0 }
 0x4e4   :  { %v2524_v21 = vadd.f32 %v3272_v16, %v2406_v57  ;;  %v2518_v60 = vpop.f32.mrb[37].mxu0 }
 0x4e5   :  { %v2519_v17 = vadd.f32 %v2518_v60, %v2405_v32 }
 0x4e6   :  { %v2561_v62 = vsel %vm2557_vm4, %v2524_v21, -inf }
 0x4e7   :  { %2562 = vmax.xlane.f32.xlu1 %v2561_v62  ;;  %v3275_v41 = vpop.f32.mrb[38].mxu0  ;;  %v2558_v54 = vsel %vm2557_vm4, %v2519_v17, -inf }
 0x4e8   :  { %v2534_v12 = vadd.f32 %v3275_v41, %v2408_v28  ;;  %v2528_v19 = vpop.f32.mrb[39].mxu0  ;;  %2559 = vmax.xlane.f32.xlu0 %v2558_v54 }
 0x4e9   :  { %v2529_v9 = vadd.f32 %v2528_v19, %v2407_v18 }
 0x4ea   :  { %v2567_v42 = vsel %vm2557_vm4, %v2534_v12, -inf }
 0x4eb   :  { %2568 = vmax.xlane.f32.xlu1 %v2567_v42  ;;  %v3278_v14 = vpop.f32.mrb[40].mxu0  ;;  %v2564_v26 = vsel %vm2557_vm4, %v2529_v9, -inf }
 0x4ec   :  { %v2544_v53 = vadd.f32 %v3278_v14, %v2410_v40  ;;  %v2538_v22 = vpop.f32.mrb[41].mxu0  ;;  %2565 = vmax.xlane.f32.xlu0 %v2564_v26 }
 0x4ed   :  { %v2539_v58 = vadd.f32 %v2538_v22, %v2409_v33 }
 0x4ee   :  { %v2573_v52 = vsel %vm2557_vm4, %v2544_v53, -inf }
 0x4ef   :  { %2574 = vmax.xlane.f32.xlu1 %v2573_v52  ;;  %v3281_v44 = vpop.f32.mrb[42].mxu0  ;;  %v2570_v34 = vsel %vm2557_vm4, %v2539_v58, -inf }
 0x4f0   :  { %v2554_v1 = vadd.f32 %v3281_v44, %v2412_v31  ;;  %v2548_v5 = vpop.f32.mrb[43].mxu0  ;;  %2571 = vmax.xlane.f32.xlu0 %v2570_v34 }
 0x4f1   :  { %v2549_v10 = vadd.f32 %v2548_v5, %v2411_v50 }
 0x4f2   :  { %v2579_v2 = vsel %vm2557_vm4, %v2554_v1, -inf }
 0x4f3   :  { %2580 = vmax.xlane.f32.xlu1 %v2579_v2  ;;  %v2576_v59 = vsel %vm2557_vm4, %v2549_v10, -inf }
 0x4f4   :  { %2577 = vmax.xlane.f32.xlu0 %v2576_v59 }
 0x574   :  { %v2563_v61 = vpop.xlane.xlu1 %2562 }
 0x575   :  { %v2583_v48 = vsub.f32 %v2524_v21, %v2563_v61  ;;  %v2560_v23 = vpop.xlane.xlu0 %2559 }
 0x576   :  { %v2582_v24 = vsub.f32 %v2519_v17, %v2560_v23 }
 0x577   :  { %v2592_v3 = vmul.f32 1.442695, %v2583_v48 }
 0x578   :  { %v2590_v43 = vmul.f32 1.442695, %v2582_v24  ;;  %v2569_v11 = vpop.xlane.xlu1 %2568 }
 0x579   :  { %3395 = vpow2.f32 %v2592_v3  ;;  %v2585_v47 = vsub.f32 %v2534_v12, %v2569_v11  ;;  %v2566_v38 = vpop.xlane.xlu0 %2565 }
 0x57a   :  { %3397 = vpow2.f32 %v2590_v43  ;;  %v2584_v39 = vsub.f32 %v2529_v9, %v2566_v38 }
 0x57b   :  { %v2596_v51 = vmul.f32 1.442695, %v2585_v47 }
 0x57c   :  { %v2594_v45 = vmul.f32 1.442695, %v2584_v39  ;;  %v2575_v56 = vpop.xlane.xlu1 %2574 }
 0x57d   :  { %3399 = vpow2.f32 %v2596_v51  ;;  %v2587_v46 = vsub.f32 %v2544_v53, %v2575_v56  ;;  %v2572_v13 = vpop.xlane.xlu0 %2571  ;;  %v2801_v51 = vld [vmem:[%s4889_s7] sm:$0xff]  ;;  %v2803_v56 = vld [vmem:[%s4889_s7 + $0x10] sm:$0xff] }
 0x57e   :  { %3401 = vpow2.f32 %v2594_v45  ;;  %v2586_v7 = vsub.f32 %v2539_v58, %v2572_v13  ;;  %v2802_v45 = vld [vmem:[%s4889_s7 + $0x8] sm:$0xff]  ;;  %v2804_v13 = vld [vmem:[%s4889_s7 + $0x18] sm:$0xff] }
 0x57f   :  { %v2600_v35 = vmul.f32 1.442695, %v2587_v46  ;;  %v3366_v46 = vpack.c.bf16 %v2802_v45, %v2801_v51 }
 0x580   :  { %v2598_v49 = vmul.f32 1.442695, %v2586_v7  ;;  %v2581_v63 = vpop.xlane.xlu1 %2580  ;;  %v3370_v7 = vpack.c.bf16 %v2804_v13, %v2803_v56 }
 0x581   :  { %3403 = vpow2.f32 %v2600_v35  ;;  %v2589_v8 = vsub.f32 %v2554_v1, %v2581_v63  ;;  %v2578_v20 = vpop.xlane.xlu0 %2577  ;;  %3367 = vmatprep.subr.bf16.mxu0 %v3366_v46 }
 0x582   :  { %3405 = vpow2.f32 %v2598_v49  ;;  %v2588_v37 = vsub.f32 %v2549_v10, %v2578_v20  ;;  %3369 = vmatpush3.bf16.msra.mxu0 %v3366_v46 }
 0x583   :  { %v3396_v57 = vpop.eup %3395  ;;  %v2604_v32 = vmul.f32 1.442695, %v2589_v8  ;;  %3371 = vmatprep.subr.bf16.mxu0 %v3370_v7 }
 0x584   :  { %v3398_v16 = vpop.eup %3397  ;;  %v2602_v21 = vmul.f32 1.442695, %v2588_v37  ;;  %v2609_v60 = vsel %vm2557_vm4, %v3396_v57, 0.0 }
 0x585   :  { %3407 = vpow2.f32 %v2604_v32  ;;  %2610 = vadd.xlane.f32.xlu1 %v2609_v60  ;;  %v2606_v17 = vsel %vm2557_vm4, %v3398_v16, 0.0 }
 0x586   :  { %3409 = vpow2.f32 %v2602_v21  ;;  %2607 = vadd.xlane.f32.xlu0 %v2606_v17  ;;  %3373 = vmatpush3.bf16.msra.mxu0 %v3370_v7 }
 0x587   :  { %v3400_v28 = vpop.eup %3399 }
 0x588   :  { %v3402_v62 = vpop.eup %3401  ;;  %v2615_v18 = vsel %vm2557_vm4, %v3400_v28, 0.0 }
 0x589   :  { %2616 = vadd.xlane.f32.xlu1 %v2615_v18  ;;  %v2612_v41 = vsel %vm2557_vm4, %v3402_v62, 0.0 }
 0x58a   :  { %2613 = vadd.xlane.f32.xlu0 %v2612_v41 }
 0x58b   :  { %v3404_v54 = vpop.eup %3403 }
 0x58c   :  { %v3406_v12 = vpop.eup %3405  ;;  %v2621_v19 = vsel %vm2557_vm4, %v3404_v54, 0.0 }
 0x58d   :  { %2622 = vadd.xlane.f32.xlu1 %v2621_v19  ;;  %v2618_v9 = vsel %vm2557_vm4, %v3406_v12, 0.0 }
 0x58e   :  { %2619 = vadd.xlane.f32.xlu0 %v2618_v9 }
 0x58f   :  { %v3408_v40 = vpop.eup %3407 }
 0x590   :  { %v3410_v42 = vpop.eup %3409  ;;  %v2627_v33 = vsel %vm2557_vm4, %v3408_v40, 0.0 }
 0x591   :  { %2628 = vadd.xlane.f32.xlu1 %v2627_v33  ;;  %v2624_v14 = vsel %vm2557_vm4, %v3410_v42, 0.0 }
 0x592   :  { %2625 = vadd.xlane.f32.xlu0 %v2624_v14 }
 0x612   :  { %v2611_v26 = vpop.xlane.xlu1 %2610 }
 0x613   :  { %3411 = vrcp.f32 %v2611_v26  ;;  %v2608_v53 = vpop.xlane.xlu0 %2607  ;;  %v2997_v26 = vld [vmem:[%s4890_s8] ss:$0 sm:$0xff] }
 0x614   :  { %3413 = vrcp.f32 %v2608_v53 }
 0x616   :  { %v2617_v22 = vpop.xlane.xlu1 %2616 }
 0x617   :  { %3415 = vrcp.f32 %v2617_v22  ;;  %v2614_v58 = vpop.xlane.xlu0 %2613 }
 0x618   :  { %3417 = vrcp.f32 %v2614_v58 }
 0x61a   :  { %v2623_v31 = vpop.xlane.xlu1 %2622 }
 0x61b   :  { %3419 = vrcp.f32 %v2623_v31  ;;  %v2620_v52 = vpop.xlane.xlu0 %2619 }
 0x61c   :  { %3421 = vrcp.f32 %v2620_v52 }
 0x61d   :  { %v3412_v50 = vpop.eup %3411 }
 0x61e   :  { %v3414_v44 = vpop.eup %3413  ;;  %v2629_v34 = vpop.xlane.xlu1 %2628  ;;  %v2639_v10 = vmul.f32 %v3412_v50, %v3396_v57 }
 0x61f   :  { %3423 = vrcp.f32 %v2629_v34  ;;  %v2626_v1 = vpop.xlane.xlu0 %2625  ;;  %v2638_v5 = vmul.f32 %v3414_v44, %v3398_v16 }
 0x620   :  { %3425 = vrcp.f32 %v2626_v1 }
 0x621   :  { %v3416_v2 = vpop.eup %3415  ;;  %3292 = vmatprep.mubr.msk.f32.mxu1 %vm2557_vm4, %v2638_v5 }
 0x622   :  { %v3418_v59 = vpop.eup %3417  ;;  %3293 = vmatmul.mubr.msk.f32.vlgmr.msra.gmra.mrb[40].mxu1 %vm2557_vm4, %v2639_v10  ;;  %v2641_v48 = vmul.f32 %v3416_v2, %v3400_v28 }
 0x623   :  { %v2640_v61 = vmul.f32 %v3418_v59, %v3402_v62 }
 0x625   :  { %v3420_v23 = vpop.eup %3419  ;;  %3295 = vmatprep.mubr.msk.f32.mxu1 %vm2557_vm4, %v2640_v61 }
 0x626   :  { %v3422_v24 = vpop.eup %3421  ;;  %3296 = vmatmul.mubr.msk.f32.gmra.mrb[42].mxu1 %vm2557_vm4, %v2641_v48  ;;  %v2643_v43 = vmul.f32 %v3420_v23, %v3404_v54 }
 0x627   :  { %v2642_v3 = vmul.f32 %v3422_v24, %v3406_v12 }
 0x629   :  { %v3424_v11 = vpop.eup %3423  ;;  %3298 = vmatprep.mubr.msk.f32.mxu1 %vm2557_vm4, %v2642_v3 }
 0x62a   :  { %v3426_v47 = vpop.eup %3425  ;;  %3299 = vmatmul.mubr.msk.f32.gmra.mrb[44].mxu1 %vm2557_vm4, %v2643_v43  ;;  %v2645_v39 = vmul.f32 %v3424_v11, %v3408_v40 }
 0x62b   :  { %v2644_v38 = vmul.f32 %v3426_v47, %v3410_v42 }
 0x62d   :  { %3301 = vmatprep.mubr.msk.f32.mxu1 %vm2557_vm4, %v2644_v38 }
 0x62e   :  { %3302 = vmatmul.mubr.msk.f32.gmra.mrb[46].mxu1 %vm2557_vm4, %v2645_v39 }
 0x6f5   :  { %v3294_v35 = vpop.f32.mrb[40].mxu1 }
 0x6f6   :  { %v2780_v49 = vmul.f32 %v3294_v35, %v4734_v27  ;;  %v2740_v63 = vpop.f32.mrb[41].mxu1 }
 0x6f7   :  { %v2779_v8 = vmul.f32 %v2740_v63, %v4718_v15 }
 0x6f8   :  { %v2788_v20 = vsel %vm1043_vm5, %v2780_v49, 0.0 }
 0x6f9   :  { %v2787_v37 = vsel %vm1043_vm5, %v2779_v8, 0.0  ;;  %v3297_v57 = vpop.f32.mrb[42].mxu1 }
 0x6fa   :  { %v2789_v32 = vadd.f32 %v2788_v20, %v2787_v37  ;;  %v2750_v16 = vpop.f32.mrb[43].mxu1  ;;  %v2782_v21 = vmul.f32 %v3297_v57, %v4747_v55 }
 0x6fb   :  { %v2781_v60 = vmul.f32 %v2750_v16, %v4739_v25 }
 0x6fc   :  { %v2792_v15 = vsel %vm1043_vm5, %v2782_v21, 0.0 }
 0x6fd   :  { %v2790_v17 = vsel %vm1043_vm5, %v2781_v60, 0.0  ;;  %v3300_v28 = vpop.f32.mrb[44].mxu1 }
 0x6fe   :  { %v2791_v62 = vadd.f32 %v2790_v17, %v2789_v32  ;;  %v2784_v27 = vmul.f32 %v3300_v28, %v4762_v36  ;;  %v2760_v18 = vpop.f32.mrb[45].mxu1 }
 0x6ff   :  { %v2783_v41 = vmul.f32 %v2760_v18, %v4753_v6 }
 0x700   :  { %v2793_v54 = vadd.f32 %v2792_v15, %v2791_v62  ;;  %v2795_v12 = vsel %vm1043_vm5, %v2784_v27, 0.0 }
 0x701   :  { %v2794_v19 = vsel %vm1043_vm5, %v2783_v41, 0.0  ;;  %v3303_v9 = vpop.f32.mrb[46].mxu1 }
 0x702   :  { %v2796_v55 = vadd.f32 %v2795_v12, %v2794_v19  ;;  %v2770_v40 = vpop.f32.mrb[47].mxu1  ;;  %3312 = vmatprep.mubr.msk.f32.mxu0 %vm1043_vm5, %v2793_v54  ;;  %v2786_v25 = vmul.f32 %v3303_v9, %v4778_v4 }
 0x703   :  { %v2785_v42 = vmul.f32 %v2770_v40, %v4768_v30 }
 0x704   :  { %v2799_v14 = vsel %vm1043_vm5, %v2786_v25, 0.0 }
 0x705   :  { %v2797_v36 = vsel %vm1043_vm5, %v2785_v42, 0.0 }
 0x706   :  { %v2798_v33 = vadd.f32 %v2797_v36, %v2796_v55 }
 0x708   :  { %v2800_v6 = vadd.f32 %v2799_v14, %v2798_v33 }
 0x70a   :  { %3313 = vmatmul.mubr.msk.f32.vlgmr.msra.gmra.mrb[44].mxu0 %vm1043_vm5, %v2800_v6 }
 0x7dd   :  { %v3314_v53 = vpop.f32.mrb[44].mxu0 }
 0x7de   :  { %v2890_v22 = vadd.f32 %v3314_v53, %v2997_v26  ;;  %v2884_v58 = vpop.f32.mrb[45].mxu0 }
 0x7df   :  { %v2885_v4 = vadd.f32 %v2997_v26, %v2884_v58 }
 0x7e0   :  { %v2894_v30 = vadd.f32 %v4474_v29, %v2890_v22 }
 0x7e1   :  { %v2893_v31 = vadd.f32 %v4575_v0, %v2885_v4 }
 0x7e2   :  { %2896 = vst.msk [vmem:[#allocation2 + $0x8] sm:$0xff] %vm1988_vm3, %v2894_v30 }
 0x7e3   :  { %2895 = vst.msk [vmem:[#allocation2] sm:$0xff] %vm1988_vm3, %v2893_v31 }
 0x7e4   :  { %3442 = shalt.err (!%p3439_p4)
}
 0x7e5   :  { %s3443_s29 = scalar_lea.hbm %s4893_s11, 256 }
 0x7e6   :  { %p3444_p5 = scmp.ne.s32.totalorder %s4893_s11, %s3443_s29  ;;  %p3447_p6 = scmp.lt.u32.totalorder %s3443_s29, %s4893_s11 }
 0x7e8   :  { %p3449_p7 = pnand %p3447_p6, %p3444_p5 }
 0x7ea   :  { %3452 = shalt.err (!%p3449_p7)
}
 0x7eb   :  { %s3460_s1 = smov 128   ;;  %s3461_s13 = smov 8  }
 0x7ec   :  { %2908 = dma.vmem_to_hbm [thread:$0]  %s2903_s26, 256, %s4893_s11, [#allocation3], %s3460_s1, %s3460_s1, %s3461_s13  }
 0x7ed   :  { %3453 = dma.done.wait [#allocation3], 256  }
 0x7ee   :  { %3454 = vsyncadd [#allocation3], 4294967040 }
 0x7ef   :  { %2912 = vsyncpa [#allocation3], 1 }

</bundles_post_ra>
